<compile_context>
chip_gen: v7x
topology: tpu7x:2x2x1
jax: 0.10.0
libtpu: 0.0.40
codegen_flags: <defaults>
</compile_context>

<pallas_src>
import functools
import math

import jax
import jax.numpy as jnp
from jax.experimental import pallas as pl
from jax.experimental.pallas import tpu as pltpu  # noqa: F401  (TPU backend)

NEG_INF = -1e30   # additive causal-mask value (exp underflows to 0 after max-sub)
LANE = 128


def _layernorm(x, w, b, eps=1e-5):
    m = jnp.mean(x, axis=-1, keepdims=True)
    c = x - m
    v = jnp.mean(c * c, axis=-1, keepdims=True)
    return c * jax.lax.rsqrt(v + eps) * w + b


# --------------------------------------------------------------------------
# Fused kernel: one invocation == the whole forward pass (all layers, all batch)
# --------------------------------------------------------------------------
def transformer_kernel(x_ref, pe_ref, wqkv_ref, wo_ref, wff1_ref, wff2_ref,
                       pvec_ref, wdec_ref, bdec_ref, o_ref,
                       *, num_layers, num_heads):
    B, S, D = x_ref.shape
    H = num_heads
    hd = D // H
    BS = B * S
    F = wff1_ref.shape[-1]
    bf16, f32 = jnp.bfloat16, jnp.float32

    # positional encoding ( + dropout == identity in eval mode )
    x = (x_ref[...] + pe_ref[...][None, :, :]).reshape(BS, D)        # (BS, D) f32

    # causal mask generated in-kernel (never shipped over HBM / duplicated in VMEM)
    rows = jax.lax.broadcasted_iota(jnp.int32, (S, S), 0)
    cols = jax.lax.broadcasted_iota(jnp.int32, (S, S), 1)
    mask = jnp.where(rows >= cols, 0.0, NEG_INF).astype(f32)[None, :, :]   # (1,S,S)

    def split_heads(t):          # (BS, D) f32 -> (H*B, S, hd) bf16, no transposes
        parts = [t[:, h * hd:(h + 1) * hd].reshape(B, S, hd) for h in range(H)]
        return jnp.concatenate(parts, axis=0).astype(bf16)

    for l in range(num_layers):
        pv = pvec_ref[l]                       # (8, 128) packed small f32 params
        b_qkv = pv[0:1, :3 * D]
        b_o = pv[1:2, :D]
        ln1w, ln1b = pv[2:3, :D], pv[3:4, :D]
        b_f1 = pv[4:5, :F]
        b_f2 = pv[5:6, :D]
        ln2w, ln2b = pv[6:7, :D], pv[7:8, :D]

        # ---------- multi-head self-attention (all heads + whole batch) ----
        xb = x.astype(bf16)
        # one fused N=3D projection; q-scale already folded into wqkv / b_qkv
        qkv = jnp.dot(xb, wqkv_ref[l], preferred_element_type=f32) + b_qkv  # (BS,3D)
        qh = split_heads(qkv[:, :D])
        kh = split_heads(qkv[:, D:2 * D])
        vh = split_heads(qkv[:, 2 * D:])                                    # (HB,S,hd)

        scores = jnp.einsum('gqe,gke->gqk', qh, kh,
                            preferred_element_type=f32) + mask              # (HB,S,S)
        m = jnp.max(scores, axis=-1, keepdims=True)
        e = jnp.exp(scores - m)
        p = e * pl.reciprocal(jnp.sum(e, axis=-1, keepdims=True), approx=True)
        ctx = jnp.einsum('gqk,gke->gqe', p.astype(bf16), vh,
                         preferred_element_type=f32)                        # (HB,S,hd)

        # output projection with head-major weights: per-head accumulate,
        # no concat / transpose back to token-major.
        attn = b_o                                                           # (1, D)
        for h in range(H):
            attn = attn + jnp.dot(
                ctx[h * B:(h + 1) * B].reshape(BS, hd).astype(bf16),
                wo_ref[l, h], preferred_element_type=f32)                    # (BS, D)
        x = _layernorm(x + attn, ln1w, ln1b)

        # ---------- feed-forward (relu) -------------------------------------
        h1 = jnp.maximum(
            jnp.dot(x.astype(bf16), wff1_ref[l], preferred_element_type=f32)
            + b_f1, 0.0)
        h2 = jnp.dot(h1.astype(bf16), wff2_ref[l],
                     preferred_element_type=f32) + b_f2
        x = _layernorm(x + h2, ln2w, ln2b)

    # ---------- decoder Linear, lane-dense 128-padded output store ----------
    y = jnp.dot(x.astype(bf16), wdec_ref[...],
                preferred_element_type=f32) + bdec_ref[...]                  # (BS,pad)
    o_ref[...] = y.reshape(B, S, -1)


# --------------------------------------------------------------------------
# Parameter construction / ONE-TIME host-side prep
# --------------------------------------------------------------------------
def make_positional_encoding(max_len, d_model):
    position = jnp.arange(max_len, dtype=jnp.float32)[:, None]
    div_term = jnp.exp(jnp.arange(0, d_model, 2, dtype=jnp.float32)
                       * (-math.log(10000.0) / d_model))
    pe = jnp.zeros((max_len, d_model), jnp.float32)
    pe = pe.at[:, 0::2].set(jnp.sin(position * div_term))
    pe = pe.at[:, 1::2].set(jnp.cos(position * div_term))
    return pe  # (max_len, d_model)


def init_params(key, d_model, out_size, hidden_dim, num_layers):
    def u(k, shape, bound):
        return jax.random.uniform(k, shape, jnp.float32, -bound, bound)

    names = ['in_w_t', 'in_b', 'out_w_t', 'out_b', 'ln1_w', 'ln1_b',
             'ln2_w', 'ln2_b', 'ff1_w_t', 'ff1_b', 'ff2_w_t', 'ff2_b']
    layers = {n: [] for n in names}
    keys = jax.random.split(key, num_layers + 1)
    for l in range(num_layers):
        k = jax.random.split(keys[l], 6)
        ba = 1.0 / math.sqrt(d_model)
        bh = 1.0 / math.sqrt(hidden_dim)
        layers['in_w_t'].append(u(k[0], (3 * d_model, d_model), ba).T)   # (D, 3D)
        layers['in_b'].append(jnp.zeros((1, 3 * d_model), jnp.float32))
        layers['out_w_t'].append(u(k[1], (d_model, d_model), ba).T)      # (D, D)
        layers['out_b'].append(jnp.zeros((1, d_model), jnp.float32))
        layers['ln1_w'].append(jnp.ones((1, d_model), jnp.float32))
        layers['ln1_b'].append(jnp.zeros((1, d_model), jnp.float32))
        layers['ln2_w'].append(jnp.ones((1, d_model), jnp.float32))
        layers['ln2_b'].append(jnp.zeros((1, d_model), jnp.float32))
        layers['ff1_w_t'].append(u(k[2], (hidden_dim, d_model), ba).T)   # (D, F)
        layers['ff1_b'].append(u(k[3], (1, hidden_dim), ba))
        layers['ff2_w_t'].append(u(k[4], (d_model, hidden_dim), bh).T)   # (F, D)
        layers['ff2_b'].append(u(k[5], (1, d_model), bh))
    p = {n: jnp.stack(v) for n, v in layers.items()}
    # decoder: matches module init_weights(): bias zero, weight U(-0.1, 0.1)
    p['dec_w_t'] = u(keys[-1], (out_size, d_model), 0.1).T               # (D, out)
    p['dec_b'] = jnp.zeros((1, out_size), jnp.float32)
    return p


def prepare_kernel_params(p, num_heads):
    """One-time host-side transform (hoisted out of the forward path):
    fold q-scale into the fused QKV weights, reshape the out-projection to a
    head-major (L,H,hd,D) layout, cast matmul weights to bf16, pack the small
    f32 params into one (L,8,128) array, and pad the decoder to 128 lanes."""
    L, D, threeD = p['in_w_t'].shape
    H = num_heads
    hd = D // H
    F = p['ff1_w_t'].shape[-1]
    scale = 1.0 / math.sqrt(hd)
    bf = jnp.bfloat16
    assert 3 * D <= LANE and F <= LANE, "small-param packing assumes widths <= 128"

    # fold 1/sqrt(head_dim) into the Q columns of the fused in-projection
    col_scale = jnp.concatenate(
        [jnp.full((D,), scale, jnp.float32), jnp.ones((2 * D,), jnp.float32)])
    wqkv = (p['in_w_t'] * col_scale[None, None, :]).astype(bf)        # (L, D, 3D)
    bqkv = p['in_b'][:, 0, :] * col_scale[None, :]                    # (L, 3D)

    # head-major output-projection weights: (L, H, hd, D)
    wo_h = p['out_w_t'].reshape(L, H, hd, D).astype(bf)

    def row(v):                                                       # (L,w)->(L,1,128)
        return jnp.pad(v, ((0, 0), (0, LANE - v.shape[-1])))[:, None, :]

    pvec = jnp.concatenate([
        row(bqkv),                       # row 0: fused qkv bias (3D)
        row(p['out_b'][:, 0, :]),        # row 1: out-proj bias  (D)
        row(p['ln1_w'][:, 0, :]),        # row 2: ln1 scale      (D)
        row(p['ln1_b'][:, 0, :]),        # row 3: ln1 shift      (D)
        row(p['ff1_b'][:, 0, :]),        # row 4: ff1 bias       (F)
        row(p['ff2_b'][:, 0, :]),        # row 5: ff2 bias       (D)
        row(p['ln2_w'][:, 0, :]),        # row 6: ln2 scale      (D)
        row(p['ln2_b'][:, 0, :]),        # row 7: ln2 shift      (D)
    ], axis=1).astype(jnp.float32)                                    # (L, 8, 128)

    out_size = p['dec_w_t'].shape[-1]
    # TODO(synk): pad to a multiple of 256 on v6e/v7x (2x256 MXU) if out_size grows.
    out_pad = ((out_size + LANE - 1) // LANE) * LANE
    dec_w = jnp.pad(p['dec_w_t'], ((0, 0), (0, out_pad - out_size))).astype(bf)
    dec_b = jnp.pad(p['dec_b'], ((0, 0), (0, out_pad - out_size)))

    kp = dict(wqkv=wqkv, wo=wo_h,
              wff1=p['ff1_w_t'].astype(bf), wff2=p['ff2_w_t'].astype(bf),
              pvec=pvec, dec_w=dec_w, dec_b=dec_b)
    return kp, out_pad, out_size


# --------------------------------------------------------------------------
# Wrapper: PyTorch layout (S, B, D) in / (S, B, out) out.  Jitted; weight prep
# happens once at model-build time, not per call.
# --------------------------------------------------------------------------
@functools.partial(jax.jit, static_argnames=("num_heads", "num_layers", "out_size"))
def transformer_forward(src, pe_full, kp, *, num_heads, num_layers, out_size):
    S, B, D = src.shape
    x = jnp.transpose(src, (1, 0, 2))                    # (B, S, D) kernel layout
    pe = pe_full[:S]                                     # (S, D)
    out_pad = kp['dec_w'].shape[-1]

    kern = functools.partial(transformer_kernel,
                             num_layers=num_layers, num_heads=num_heads)

    # Single kernel step (no grid): everything fits VMEM at these sizes, all
    # inputs get full-array VMEM blocks, no per-step overhead or double-buffering.
    out = pl.pallas_call(
        kern,
        out_shape=jax.ShapeDtypeStruct((B, S, out_pad), jnp.float32),
    )(x, pe, kp['wqkv'], kp['wo'], kp['wff1'], kp['wff2'],
      kp['pvec'], kp['dec_w'], kp['dec_b'])

    out = out[:, :, :out_size]                           # drop lane padding
    return jnp.transpose(out, (1, 0, 2))                 # back to (S, B, out)


# --------------------------------------------------------------------------
# Pure-JAX f32 reference mirroring PyTorch TransformerEncoder (eval) semantics
# --------------------------------------------------------------------------
def ref_forward(src, pe_full, p, *, num_heads, num_layers):
    S, B, D = src.shape
    hd = D // num_heads
    scale = 1.0 / math.sqrt(hd)
    x = (jnp.transpose(src, (1, 0, 2)) + pe_full[:S][None]).reshape(B * S, D)
    lower = jnp.tril(jnp.ones((S, S), dtype=bool))
    mask = jnp.where(lower, 0.0, NEG_INF)[None]
    for l in range(num_layers):
        qkv = x @ p['in_w_t'][l] + p['in_b'][l]
        q, k, v = qkv[:, :D], qkv[:, D:2 * D], qkv[:, 2 * D:]
        heads = []
        for h in range(num_heads):
            sl = slice(h * hd, (h + 1) * hd)
            qh = (q[:, sl] * scale).reshape(B, S, hd)
            kh = k[:, sl].reshape(B, S, hd)
            vh = v[:, sl].reshape(B, S, hd)
            s = jnp.einsum('bqd,bkd->bqk', qh, kh) + mask
            pm = jax.nn.softmax(s, axis=-1)
            heads.append(jnp.einsum('bqk,bkd->bqd', pm, vh).reshape(B * S, hd))
        attn = jnp.concatenate(heads, axis=-1) @ p['out_w_t'][l] + p['out_b'][l]
        x = _layernorm(x + attn, p['ln1_w'][l], p['ln1_b'][l])
        h1 = jnp.maximum(x @ p['ff1_w_t'][l] + p['ff1_b'][l], 0.0)
        x = _layernorm(x + h1 @ p['ff2_w_t'][l] + p['ff2_b'][l],
                       p['ln2_w'][l], p['ln2_b'][l])
    out = x @ p['dec_w_t'] + p['dec_b']
    return jnp.transpose(out.reshape(B, S, -1), (1, 0, 2))


if __name__ == "__main__":
    # Model hyper-params (small, consistent with the module's __init__):
    input_size = 32          # d_model
    output_size = 16
    attention_heads = 4
    hidden_dim = 64          # feed-forward dim
    num_layers = 2
    max_sequence_length = 64
    S, B = 8, 2              # sequence length, batch

    key = jax.random.PRNGKey(0)
    kparam, kx = jax.random.split(key)
    params = init_params(kparam, input_size, output_size, hidden_dim, num_layers)
    pe_full = make_positional_encoding(max_sequence_length, input_size)
    src = jax.random.normal(kx, (S, B, input_size), jnp.float32)

    # one-time host-side weight prep (hoisted out of the forward path)
    kp, out_pad, out_size = prepare_kernel_params(params, attention_heads)

    out = transformer_forward(src, pe_full, kp,
                              num_heads=attention_heads, num_layers=num_layers,
                              out_size=out_size)
    out = jax.block_until_ready(out)

    ref = ref_forward(src, pe_full, params,
                      num_heads=attention_heads, num_layers=num_layers)
    assert out.shape == (S, B, output_size)
    assert bool(jnp.all(jnp.isfinite(out)))
    # bf16 matmul operands (f32 accumulation) + approx reciprocal vs f32 reference.
    assert bool(jnp.allclose(out, ref, rtol=5e-2, atol=5e-2)), "mismatch vs reference"

    print("KERNEL_OK")
</pallas_src>

<mosaic_0001>
module attributes {stable_mosaic.version = 11 : i64} {
  func.func @transformer_kernel(%arg0: memref<2x8x32xf32, #tpu.memory_space<vmem>>, %arg1: memref<8x32xf32, #tpu.memory_space<vmem>>, %arg2: memref<2x32x96xbf16, #tpu.memory_space<vmem>>, %arg3: memref<2x4x8x32xbf16, #tpu.memory_space<vmem>>, %arg4: memref<2x32x64xbf16, #tpu.memory_space<vmem>>, %arg5: memref<2x64x32xbf16, #tpu.memory_space<vmem>>, %arg6: memref<2x8x128xf32, #tpu.memory_space<vmem>>, %arg7: memref<32x128xbf16, #tpu.memory_space<vmem>>, %arg8: memref<1x128xf32, #tpu.memory_space<vmem>>, %arg9: memref<2x8x128xf32, #tpu.memory_space<vmem>>) attributes {dimension_semantics = [], scalar_prefetch = 0 : i64, scratch_operands = 0 : i64, tpu.core_type = #tpu.core_type<tc>} {
    %c0 = arith.constant 0 : index
    %c0_0 = arith.constant 0 : index
    %c0_1 = arith.constant 0 : index
    %0 = vector.load %arg0[%c0, %c0_0, %c0_1] : memref<2x8x32xf32, #tpu.memory_space<vmem>>, vector<2x8x32xf32>
    %c0_2 = arith.constant 0 : index
    %c0_3 = arith.constant 0 : index
    %1 = vector.load %arg1[%c0_2, %c0_3] : memref<8x32xf32, #tpu.memory_space<vmem>>, vector<8x32xf32>
    %2 = vector.shape_cast %1 : vector<8x32xf32> to vector<1x8x32xf32>
    %3 = vector.broadcast %2 : vector<1x8x32xf32> to vector<2x8x32xf32>
    %4 = arith.addf %0, %3 : vector<2x8x32xf32>
    %5 = vector.shape_cast %4 : vector<2x8x32xf32> to vector<16x32xf32>
    %6 = tpu.iota {dimensions = array<i32: 0>} : vector<8x8xi32>
    %7 = tpu.iota {dimensions = array<i32: 1>} : vector<8x8xi32>
    %8 = arith.cmpi sge, %6, %7 : vector<8x8xi32>
    %cst = arith.constant 0.000000e+00 : f32
    %cst_4 = arith.constant -1.000000e+30 : f32
    %9 = vector.broadcast %cst : f32 to vector<8x8xf32>
    %10 = vector.broadcast %cst_4 : f32 to vector<8x8xf32>
    %11 = arith.select %8, %9, %10 : vector<8x8xi1>, vector<8x8xf32>
    %12 = vector.shape_cast %11 : vector<8x8xf32> to vector<1x8x8xf32>
    %c0_5 = arith.constant 0 : index
    %c0_6 = arith.constant 0 : index
    %c0_7 = arith.constant 0 : index
    %13 = vector.load %arg6[%c0_5, %c0_6, %c0_7] : memref<2x8x128xf32, #tpu.memory_space<vmem>>, vector<1x8x128xf32>
    %14 = vector.shape_cast %13 : vector<1x8x128xf32> to vector<8x128xf32>
    %15 = vector.extract_strided_slice %14 {offsets = [0, 0], sizes = [1, 96], strides = [1, 1]} : vector<8x128xf32> to vector<1x96xf32>
    %16 = vector.extract_strided_slice %14 {offsets = [1, 0], sizes = [1, 32], strides = [1, 1]} : vector<8x128xf32> to vector<1x32xf32>
    %17 = vector.extract_strided_slice %14 {offsets = [2, 0], sizes = [1, 32], strides = [1, 1]} : vector<8x128xf32> to vector<1x32xf32>
    %18 = vector.extract_strided_slice %14 {offsets = [3, 0], sizes = [1, 32], strides = [1, 1]} : vector<8x128xf32> to vector<1x32xf32>
    %19 = vector.extract_strided_slice %14 {offsets = [4, 0], sizes = [1, 64], strides = [1, 1]} : vector<8x128xf32> to vector<1x64xf32>
    %20 = vector.extract_strided_slice %14 {offsets = [5, 0], sizes = [1, 32], strides = [1, 1]} : vector<8x128xf32> to vector<1x32xf32>
    %21 = vector.extract_strided_slice %14 {offsets = [6, 0], sizes = [1, 32], strides = [1, 1]} : vector<8x128xf32> to vector<1x32xf32>
    %22 = vector.extract_strided_slice %14 {offsets = [7, 0], sizes = [1, 32], strides = [1, 1]} : vector<8x128xf32> to vector<1x32xf32>
    %23 = arith.truncf %5 : vector<16x32xf32> to vector<16x32xbf16>
    %c0_8 = arith.constant 0 : index
    %c0_9 = arith.constant 0 : index
    %c0_10 = arith.constant 0 : index
    %24 = vector.load %arg2[%c0_8, %c0_9, %c0_10] : memref<2x32x96xbf16, #tpu.memory_space<vmem>>, vector<1x32x96xbf16>
    %25 = vector.shape_cast %24 : vector<1x32x96xbf16> to vector<32x96xbf16>
    %cst_11 = arith.constant dense<0.000000e+00> : vector<16x96xf32>
    %26 = tpu.matmul %23, %25, %cst_11 {dimension_numbers = #tpu.dot_dimension_numbers<[1], [0], [0], [1], [0, 0, 1, 1], [], []>} : vector<16x32xbf16>, vector<32x96xbf16>, vector<16x96xf32> -> vector<16x96xf32>
    %27 = vector.broadcast %15 : vector<1x96xf32> to vector<16x96xf32>
    %28 = arith.addf %26, %27 : vector<16x96xf32>
    %29 = vector.extract_strided_slice %28 {offsets = [0, 0], sizes = [16, 32], strides = [1, 1]} : vector<16x96xf32> to vector<16x32xf32>
    %30 = vector.extract_strided_slice %29 {offsets = [0, 0], sizes = [16, 8], strides = [1, 1]} : vector<16x32xf32> to vector<16x8xf32>
    %31 = vector.shape_cast %30 : vector<16x8xf32> to vector<2x8x8xf32>
    %32 = vector.extract_strided_slice %29 {offsets = [0, 8], sizes = [16, 8], strides = [1, 1]} : vector<16x32xf32> to vector<16x8xf32>
    %33 = vector.shape_cast %32 : vector<16x8xf32> to vector<2x8x8xf32>
    %34 = vector.extract_strided_slice %29 {offsets = [0, 16], sizes = [16, 8], strides = [1, 1]} : vector<16x32xf32> to vector<16x8xf32>
    %35 = vector.shape_cast %34 : vector<16x8xf32> to vector<2x8x8xf32>
    %36 = vector.extract_strided_slice %29 {offsets = [0, 24], sizes = [16, 8], strides = [1, 1]} : vector<16x32xf32> to vector<16x8xf32>
    %37 = vector.shape_cast %36 : vector<16x8xf32> to vector<2x8x8xf32>
    %38 = tpu.concatenate %31, %33, %35, %37 in 0 : vector<2x8x8xf32>, vector<2x8x8xf32>, vector<2x8x8xf32>, vector<2x8x8xf32> -> vector<8x8x8xf32>
    %39 = arith.truncf %38 : vector<8x8x8xf32> to vector<8x8x8xbf16>
    %40 = vector.extract_strided_slice %28 {offsets = [0, 32], sizes = [16, 32], strides = [1, 1]} : vector<16x96xf32> to vector<16x32xf32>
    %41 = vector.extract_strided_slice %40 {offsets = [0, 0], sizes = [16, 8], strides = [1, 1]} : vector<16x32xf32> to vector<16x8xf32>
    %42 = vector.shape_cast %41 : vector<16x8xf32> to vector<2x8x8xf32>
    %43 = vector.extract_strided_slice %40 {offsets = [0, 8], sizes = [16, 8], strides = [1, 1]} : vector<16x32xf32> to vector<16x8xf32>
    %44 = vector.shape_cast %43 : vector<16x8xf32> to vector<2x8x8xf32>
    %45 = vector.extract_strided_slice %40 {offsets = [0, 16], sizes = [16, 8], strides = [1, 1]} : vector<16x32xf32> to vector<16x8xf32>
    %46 = vector.shape_cast %45 : vector<16x8xf32> to vector<2x8x8xf32>
    %47 = vector.extract_strided_slice %40 {offsets = [0, 24], sizes = [16, 8], strides = [1, 1]} : vector<16x32xf32> to vector<16x8xf32>
    %48 = vector.shape_cast %47 : vector<16x8xf32> to vector<2x8x8xf32>
    %49 = tpu.concatenate %42, %44, %46, %48 in 0 : vector<2x8x8xf32>, vector<2x8x8xf32>, vector<2x8x8xf32>, vector<2x8x8xf32> -> vector<8x8x8xf32>
    %50 = arith.truncf %49 : vector<8x8x8xf32> to vector<8x8x8xbf16>
    %51 = vector.extract_strided_slice %28 {offsets = [0, 64], sizes = [16, 32], strides = [1, 1]} : vector<16x96xf32> to vector<16x32xf32>
    %52 = vector.extract_strided_slice %51 {offsets = [0, 0], sizes = [16, 8], strides = [1, 1]} : vector<16x32xf32> to vector<16x8xf32>
    %53 = vector.shape_cast %52 : vector<16x8xf32> to vector<2x8x8xf32>
    %54 = vector.extract_strided_slice %51 {offsets = [0, 8], sizes = [16, 8], strides = [1, 1]} : vector<16x32xf32> to vector<16x8xf32>
    %55 = vector.shape_cast %54 : vector<16x8xf32> to vector<2x8x8xf32>
    %56 = vector.extract_strided_slice %51 {offsets = [0, 16], sizes = [16, 8], strides = [1, 1]} : vector<16x32xf32> to vector<16x8xf32>
    %57 = vector.shape_cast %56 : vector<16x8xf32> to vector<2x8x8xf32>
    %58 = vector.extract_strided_slice %51 {offsets = [0, 24], sizes = [16, 8], strides = [1, 1]} : vector<16x32xf32> to vector<16x8xf32>
    %59 = vector.shape_cast %58 : vector<16x8xf32> to vector<2x8x8xf32>
    %60 = tpu.concatenate %53, %55, %57, %59 in 0 : vector<2x8x8xf32>, vector<2x8x8xf32>, vector<2x8x8xf32>, vector<2x8x8xf32> -> vector<8x8x8xf32>
    %61 = arith.truncf %60 : vector<8x8x8xf32> to vector<8x8x8xbf16>
    "tpu.trace_start"() <{level = 10 : i32, message = "gqe,gke->gqk"}> : () -> ()
    %cst_12 = arith.constant dense<0.000000e+00> : vector<8x8x8xf32>
    %62 = tpu.matmul %39, %50, %cst_12 {dimension_numbers = #tpu.dot_dimension_numbers<[2], [2], [1], [1], [0, 0, 0, 1, 1, 1], [0], [0]>} : vector<8x8x8xbf16>, vector<8x8x8xbf16>, vector<8x8x8xf32> -> vector<8x8x8xf32>
    "tpu.trace_stop"() : () -> ()
    %63 = vector.broadcast %12 : vector<1x8x8xf32> to vector<8x8x8xf32>
    %64 = arith.addf %62, %63 : vector<8x8x8xf32>
    %cst_13 = arith.constant dense<0xFF800000> : vector<8x8xf32>
    %65 = vector.multi_reduction <maximumf>, %64, %cst_13 [2] : vector<8x8x8xf32> to vector<8x8xf32>
    %66 = vector.shape_cast %65 : vector<8x8xf32> to vector<8x8x1xf32>
    %67 = vector.broadcast %66 : vector<8x8x1xf32> to vector<8x8x8xf32>
    %68 = arith.subf %64, %67 : vector<8x8x8xf32>
    %69 = math.exp %68 : vector<8x8x8xf32>
    %cst_14 = arith.constant dense<0.000000e+00> : vector<8x8xf32>
    %70 = vector.multi_reduction <add>, %69, %cst_14 [2] : vector<8x8x8xf32> to vector<8x8xf32>
    %71 = vector.shape_cast %70 : vector<8x8xf32> to vector<8x8x1xf32>
    %72 = tpu.reciprocal %71 {approx = true} : vector<8x8x1xf32> -> vector<8x8x1xf32>
    %73 = vector.broadcast %72 : vector<8x8x1xf32> to vector<8x8x8xf32>
    %74 = arith.mulf %69, %73 : vector<8x8x8xf32>
    %75 = arith.truncf %74 : vector<8x8x8xf32> to vector<8x8x8xbf16>
    "tpu.trace_start"() <{level = 10 : i32, message = "gqk,gke->gqe"}> : () -> ()
    %cst_15 = arith.constant dense<0.000000e+00> : vector<8x8x8xf32>
    %76 = tpu.matmul %75, %61, %cst_15 {dimension_numbers = #tpu.dot_dimension_numbers<[2], [1], [1], [2], [0, 0, 0, 1, 1, 2], [0], [0]>} : vector<8x8x8xbf16>, vector<8x8x8xbf16>, vector<8x8x8xf32> -> vector<8x8x8xf32>
    "tpu.trace_stop"() : () -> ()
    %77 = vector.extract_strided_slice %76 {offsets = [0, 0, 0], sizes = [2, 8, 8], strides = [1, 1, 1]} : vector<8x8x8xf32> to vector<2x8x8xf32>
    %78 = vector.shape_cast %77 : vector<2x8x8xf32> to vector<16x8xf32>
    %79 = arith.truncf %78 : vector<16x8xf32> to vector<16x8xbf16>
    %c0_16 = arith.constant 0 : index
    %c0_17 = arith.constant 0 : index
    %c0_18 = arith.constant 0 : index
    %c0_19 = arith.constant 0 : index
    %80 = vector.load %arg3[%c0_16, %c0_17, %c0_18, %c0_19] : memref<2x4x8x32xbf16, #tpu.memory_space<vmem>>, vector<1x1x8x32xbf16>
    %81 = vector.shape_cast %80 : vector<1x1x8x32xbf16> to vector<8x32xbf16>
    %cst_20 = arith.constant dense<0.000000e+00> : vector<16x32xf32>
    %82 = tpu.matmul %79, %81, %cst_20 {dimension_numbers = #tpu.dot_dimension_numbers<[1], [0], [0], [1], [0, 0, 1, 1], [], []>} : vector<16x8xbf16>, vector<8x32xbf16>, vector<16x32xf32> -> vector<16x32xf32>
    %83 = vector.broadcast %16 : vector<1x32xf32> to vector<16x32xf32>
    %84 = arith.addf %83, %82 : vector<16x32xf32>
    %85 = vector.extract_strided_slice %76 {offsets = [2, 0, 0], sizes = [2, 8, 8], strides = [1, 1, 1]} : vector<8x8x8xf32> to vector<2x8x8xf32>
    %86 = vector.shape_cast %85 : vector<2x8x8xf32> to vector<16x8xf32>
    %87 = arith.truncf %86 : vector<16x8xf32> to vector<16x8xbf16>
    %c0_21 = arith.constant 0 : index
    %c1 = arith.constant 1 : index
    %c0_22 = arith.constant 0 : index
    %c0_23 = arith.constant 0 : index
    %88 = vector.load %arg3[%c0_21, %c1, %c0_22, %c0_23] : memref<2x4x8x32xbf16, #tpu.memory_space<vmem>>, vector<1x1x8x32xbf16>
    %89 = vector.shape_cast %88 : vector<1x1x8x32xbf16> to vector<8x32xbf16>
    %cst_24 = arith.constant dense<0.000000e+00> : vector<16x32xf32>
    %90 = tpu.matmul %87, %89, %cst_24 {dimension_numbers = #tpu.dot_dimension_numbers<[1], [0], [0], [1], [0, 0, 1, 1], [], []>} : vector<16x8xbf16>, vector<8x32xbf16>, vector<16x32xf32> -> vector<16x32xf32>
    %91 = arith.addf %84, %90 : vector<16x32xf32>
    %92 = vector.extract_strided_slice %76 {offsets = [4, 0, 0], sizes = [2, 8, 8], strides = [1, 1, 1]} : vector<8x8x8xf32> to vector<2x8x8xf32>
    %93 = vector.shape_cast %92 : vector<2x8x8xf32> to vector<16x8xf32>
    %94 = arith.truncf %93 : vector<16x8xf32> to vector<16x8xbf16>
    %c0_25 = arith.constant 0 : index
    %c2 = arith.constant 2 : index
    %c0_26 = arith.constant 0 : index
    %c0_27 = arith.constant 0 : index
    %95 = vector.load %arg3[%c0_25, %c2, %c0_26, %c0_27] : memref<2x4x8x32xbf16, #tpu.memory_space<vmem>>, vector<1x1x8x32xbf16>
    %96 = vector.shape_cast %95 : vector<1x1x8x32xbf16> to vector<8x32xbf16>
    %cst_28 = arith.constant dense<0.000000e+00> : vector<16x32xf32>
    %97 = tpu.matmul %94, %96, %cst_28 {dimension_numbers = #tpu.dot_dimension_numbers<[1], [0], [0], [1], [0, 0, 1, 1], [], []>} : vector<16x8xbf16>, vector<8x32xbf16>, vector<16x32xf32> -> vector<16x32xf32>
    %98 = arith.addf %91, %97 : vector<16x32xf32>
    %99 = vector.extract_strided_slice %76 {offsets = [6, 0, 0], sizes = [2, 8, 8], strides = [1, 1, 1]} : vector<8x8x8xf32> to vector<2x8x8xf32>
    %100 = vector.shape_cast %99 : vector<2x8x8xf32> to vector<16x8xf32>
    %101 = arith.truncf %100 : vector<16x8xf32> to vector<16x8xbf16>
    %c0_29 = arith.constant 0 : index
    %c3 = arith.constant 3 : index
    %c0_30 = arith.constant 0 : index
    %c0_31 = arith.constant 0 : index
    %102 = vector.load %arg3[%c0_29, %c3, %c0_30, %c0_31] : memref<2x4x8x32xbf16, #tpu.memory_space<vmem>>, vector<1x1x8x32xbf16>
    %103 = vector.shape_cast %102 : vector<1x1x8x32xbf16> to vector<8x32xbf16>
    %cst_32 = arith.constant dense<0.000000e+00> : vector<16x32xf32>
    %104 = tpu.matmul %101, %103, %cst_32 {dimension_numbers = #tpu.dot_dimension_numbers<[1], [0], [0], [1], [0, 0, 1, 1], [], []>} : vector<16x8xbf16>, vector<8x32xbf16>, vector<16x32xf32> -> vector<16x32xf32>
    %105 = arith.addf %98, %104 : vector<16x32xf32>
    %106 = arith.addf %5, %105 : vector<16x32xf32>
    %cst_33 = arith.constant dense<0.000000e+00> : vector<16xf32>
    %107 = vector.multi_reduction <add>, %106, %cst_33 [1] : vector<16x32xf32> to vector<16xf32>
    %108 = vector.shape_cast %107 : vector<16xf32> to vector<16x1xf32>
    %cst_34 = arith.constant 3.200000e+01 : f32
    %109 = vector.broadcast %cst_34 : f32 to vector<16x1xf32>
    %110 = arith.divf %108, %109 : vector<16x1xf32>
    %111 = vector.broadcast %110 : vector<16x1xf32> to vector<16x32xf32>
    %112 = arith.subf %106, %111 : vector<16x32xf32>
    %113 = arith.mulf %112, %112 : vector<16x32xf32>
    %cst_35 = arith.constant dense<0.000000e+00> : vector<16xf32>
    %114 = vector.multi_reduction <add>, %113, %cst_35 [1] : vector<16x32xf32> to vector<16xf32>
    %115 = vector.shape_cast %114 : vector<16xf32> to vector<16x1xf32>
    %cst_36 = arith.constant 3.200000e+01 : f32
    %116 = vector.broadcast %cst_36 : f32 to vector<16x1xf32>
    %117 = arith.divf %115, %116 : vector<16x1xf32>
    %cst_37 = arith.constant 9.99999974E-6 : f32
    %118 = vector.broadcast %cst_37 : f32 to vector<16x1xf32>
    %119 = arith.addf %117, %118 : vector<16x1xf32>
    %120 = math.rsqrt %119 : vector<16x1xf32>
    %121 = vector.broadcast %120 : vector<16x1xf32> to vector<16x32xf32>
    %122 = arith.mulf %112, %121 : vector<16x32xf32>
    %123 = vector.broadcast %17 : vector<1x32xf32> to vector<16x32xf32>
    %124 = arith.mulf %122, %123 : vector<16x32xf32>
    %125 = vector.broadcast %18 : vector<1x32xf32> to vector<16x32xf32>
    %126 = arith.addf %124, %125 : vector<16x32xf32>
    %127 = arith.truncf %126 : vector<16x32xf32> to vector<16x32xbf16>
    %c0_38 = arith.constant 0 : index
    %c0_39 = arith.constant 0 : index
    %c0_40 = arith.constant 0 : index
    %128 = vector.load %arg4[%c0_38, %c0_39, %c0_40] : memref<2x32x64xbf16, #tpu.memory_space<vmem>>, vector<1x32x64xbf16>
    %129 = vector.shape_cast %128 : vector<1x32x64xbf16> to vector<32x64xbf16>
    %cst_41 = arith.constant dense<0.000000e+00> : vector<16x64xf32>
    %130 = tpu.matmul %127, %129, %cst_41 {dimension_numbers = #tpu.dot_dimension_numbers<[1], [0], [0], [1], [0, 0, 1, 1], [], []>} : vector<16x32xbf16>, vector<32x64xbf16>, vector<16x64xf32> -> vector<16x64xf32>
    %131 = vector.broadcast %19 : vector<1x64xf32> to vector<16x64xf32>
    %132 = arith.addf %130, %131 : vector<16x64xf32>
    %cst_42 = arith.constant 0.000000e+00 : f32
    %133 = vector.broadcast %cst_42 : f32 to vector<16x64xf32>
    %134 = arith.maximumf %132, %133 : vector<16x64xf32>
    %135 = arith.truncf %134 : vector<16x64xf32> to vector<16x64xbf16>
    %c0_43 = arith.constant 0 : index
    %c0_44 = arith.constant 0 : index
    %c0_45 = arith.constant 0 : index
    %136 = vector.load %arg5[%c0_43, %c0_44, %c0_45] : memref<2x64x32xbf16, #tpu.memory_space<vmem>>, vector<1x64x32xbf16>
    %137 = vector.shape_cast %136 : vector<1x64x32xbf16> to vector<64x32xbf16>
    %cst_46 = arith.constant dense<0.000000e+00> : vector<16x32xf32>
    %138 = tpu.matmul %135, %137, %cst_46 {dimension_numbers = #tpu.dot_dimension_numbers<[1], [0], [0], [1], [0, 0, 1, 1], [], []>} : vector<16x64xbf16>, vector<64x32xbf16>, vector<16x32xf32> -> vector<16x32xf32>
    %139 = vector.broadcast %20 : vector<1x32xf32> to vector<16x32xf32>
    %140 = arith.addf %138, %139 : vector<16x32xf32>
    %141 = arith.addf %126, %140 : vector<16x32xf32>
    %cst_47 = arith.constant dense<0.000000e+00> : vector<16xf32>
    %142 = vector.multi_reduction <add>, %141, %cst_47 [1] : vector<16x32xf32> to vector<16xf32>
    %143 = vector.shape_cast %142 : vector<16xf32> to vector<16x1xf32>
    %cst_48 = arith.constant 3.200000e+01 : f32
    %144 = vector.broadcast %cst_48 : f32 to vector<16x1xf32>
    %145 = arith.divf %143, %144 : vector<16x1xf32>
    %146 = vector.broadcast %145 : vector<16x1xf32> to vector<16x32xf32>
    %147 = arith.subf %141, %146 : vector<16x32xf32>
    %148 = arith.mulf %147, %147 : vector<16x32xf32>
    %cst_49 = arith.constant dense<0.000000e+00> : vector<16xf32>
    %149 = vector.multi_reduction <add>, %148, %cst_49 [1] : vector<16x32xf32> to vector<16xf32>
    %150 = vector.shape_cast %149 : vector<16xf32> to vector<16x1xf32>
    %cst_50 = arith.constant 3.200000e+01 : f32
    %151 = vector.broadcast %cst_50 : f32 to vector<16x1xf32>
    %152 = arith.divf %150, %151 : vector<16x1xf32>
    %cst_51 = arith.constant 9.99999974E-6 : f32
    %153 = vector.broadcast %cst_51 : f32 to vector<16x1xf32>
    %154 = arith.addf %152, %153 : vector<16x1xf32>
    %155 = math.rsqrt %154 : vector<16x1xf32>
    %156 = vector.broadcast %155 : vector<16x1xf32> to vector<16x32xf32>
    %157 = arith.mulf %147, %156 : vector<16x32xf32>
    %158 = vector.broadcast %21 : vector<1x32xf32> to vector<16x32xf32>
    %159 = arith.mulf %157, %158 : vector<16x32xf32>
    %160 = vector.broadcast %22 : vector<1x32xf32> to vector<16x32xf32>
    %161 = arith.addf %159, %160 : vector<16x32xf32>
    %c1_52 = arith.constant 1 : index
    %c0_53 = arith.constant 0 : index
    %c0_54 = arith.constant 0 : index
    %162 = vector.load %arg6[%c1_52, %c0_53, %c0_54] : memref<2x8x128xf32, #tpu.memory_space<vmem>>, vector<1x8x128xf32>
    %163 = vector.shape_cast %162 : vector<1x8x128xf32> to vector<8x128xf32>
    %164 = vector.extract_strided_slice %163 {offsets = [0, 0], sizes = [1, 96], strides = [1, 1]} : vector<8x128xf32> to vector<1x96xf32>
    %165 = vector.extract_strided_slice %163 {offsets = [1, 0], sizes = [1, 32], strides = [1, 1]} : vector<8x128xf32> to vector<1x32xf32>
    %166 = vector.extract_strided_slice %163 {offsets = [2, 0], sizes = [1, 32], strides = [1, 1]} : vector<8x128xf32> to vector<1x32xf32>
    %167 = vector.extract_strided_slice %163 {offsets = [3, 0], sizes = [1, 32], strides = [1, 1]} : vector<8x128xf32> to vector<1x32xf32>
    %168 = vector.extract_strided_slice %163 {offsets = [4, 0], sizes = [1, 64], strides = [1, 1]} : vector<8x128xf32> to vector<1x64xf32>
    %169 = vector.extract_strided_slice %163 {offsets = [5, 0], sizes = [1, 32], strides = [1, 1]} : vector<8x128xf32> to vector<1x32xf32>
    %170 = vector.extract_strided_slice %163 {offsets = [6, 0], sizes = [1, 32], strides = [1, 1]} : vector<8x128xf32> to vector<1x32xf32>
    %171 = vector.extract_strided_slice %163 {offsets = [7, 0], sizes = [1, 32], strides = [1, 1]} : vector<8x128xf32> to vector<1x32xf32>
    %172 = arith.truncf %161 : vector<16x32xf32> to vector<16x32xbf16>
    %c1_55 = arith.constant 1 : index
    %c0_56 = arith.constant 0 : index
    %c0_57 = arith.constant 0 : index
    %173 = vector.load %arg2[%c1_55, %c0_56, %c0_57] : memref<2x32x96xbf16, #tpu.memory_space<vmem>>, vector<1x32x96xbf16>
    %174 = vector.shape_cast %173 : vector<1x32x96xbf16> to vector<32x96xbf16>
    %cst_58 = arith.constant dense<0.000000e+00> : vector<16x96xf32>
    %175 = tpu.matmul %172, %174, %cst_58 {dimension_numbers = #tpu.dot_dimension_numbers<[1], [0], [0], [1], [0, 0, 1, 1], [], []>} : vector<16x32xbf16>, vector<32x96xbf16>, vector<16x96xf32> -> vector<16x96xf32>
    %176 = vector.broadcast %164 : vector<1x96xf32> to vector<16x96xf32>
    %177 = arith.addf %175, %176 : vector<16x96xf32>
    %178 = vector.extract_strided_slice %177 {offsets = [0, 0], sizes = [16, 32], strides = [1, 1]} : vector<16x96xf32> to vector<16x32xf32>
    %179 = vector.extract_strided_slice %178 {offsets = [0, 0], sizes = [16, 8], strides = [1, 1]} : vector<16x32xf32> to vector<16x8xf32>
    %180 = vector.shape_cast %179 : vector<16x8xf32> to vector<2x8x8xf32>
    %181 = vector.extract_strided_slice %178 {offsets = [0, 8], sizes = [16, 8], strides = [1, 1]} : vector<16x32xf32> to vector<16x8xf32>
    %182 = vector.shape_cast %181 : vector<16x8xf32> to vector<2x8x8xf32>
    %183 = vector.extract_strided_slice %178 {offsets = [0, 16], sizes = [16, 8], strides = [1, 1]} : vector<16x32xf32> to vector<16x8xf32>
    %184 = vector.shape_cast %183 : vector<16x8xf32> to vector<2x8x8xf32>
    %185 = vector.extract_strided_slice %178 {offsets = [0, 24], sizes = [16, 8], strides = [1, 1]} : vector<16x32xf32> to vector<16x8xf32>
    %186 = vector.shape_cast %185 : vector<16x8xf32> to vector<2x8x8xf32>
    %187 = tpu.concatenate %180, %182, %184, %186 in 0 : vector<2x8x8xf32>, vector<2x8x8xf32>, vector<2x8x8xf32>, vector<2x8x8xf32> -> vector<8x8x8xf32>
    %188 = arith.truncf %187 : vector<8x8x8xf32> to vector<8x8x8xbf16>
    %189 = vector.extract_strided_slice %177 {offsets = [0, 32], sizes = [16, 32], strides = [1, 1]} : vector<16x96xf32> to vector<16x32xf32>
    %190 = vector.extract_strided_slice %189 {offsets = [0, 0], sizes = [16, 8], strides = [1, 1]} : vector<16x32xf32> to vector<16x8xf32>
    %191 = vector.shape_cast %190 : vector<16x8xf32> to vector<2x8x8xf32>
    %192 = vector.extract_strided_slice %189 {offsets = [0, 8], sizes = [16, 8], strides = [1, 1]} : vector<16x32xf32> to vector<16x8xf32>
    %193 = vector.shape_cast %192 : vector<16x8xf32> to vector<2x8x8xf32>
    %194 = vector.extract_strided_slice %189 {offsets = [0, 16], sizes = [16, 8], strides = [1, 1]} : vector<16x32xf32> to vector<16x8xf32>
    %195 = vector.shape_cast %194 : vector<16x8xf32> to vector<2x8x8xf32>
    %196 = vector.extract_strided_slice %189 {offsets = [0, 24], sizes = [16, 8], strides = [1, 1]} : vector<16x32xf32> to vector<16x8xf32>
    %197 = vector.shape_cast %196 : vector<16x8xf32> to vector<2x8x8xf32>
    %198 = tpu.concatenate %191, %193, %195, %197 in 0 : vector<2x8x8xf32>, vector<2x8x8xf32>, vector<2x8x8xf32>, vector<2x8x8xf32> -> vector<8x8x8xf32>
    %199 = arith.truncf %198 : vector<8x8x8xf32> to vector<8x8x8xbf16>
    %200 = vector.extract_strided_slice %177 {offsets = [0, 64], sizes = [16, 32], strides = [1, 1]} : vector<16x96xf32> to vector<16x32xf32>
    %201 = vector.extract_strided_slice %200 {offsets = [0, 0], sizes = [16, 8], strides = [1, 1]} : vector<16x32xf32> to vector<16x8xf32>
    %202 = vector.shape_cast %201 : vector<16x8xf32> to vector<2x8x8xf32>
    %203 = vector.extract_strided_slice %200 {offsets = [0, 8], sizes = [16, 8], strides = [1, 1]} : vector<16x32xf32> to vector<16x8xf32>
    %204 = vector.shape_cast %203 : vector<16x8xf32> to vector<2x8x8xf32>
    %205 = vector.extract_strided_slice %200 {offsets = [0, 16], sizes = [16, 8], strides = [1, 1]} : vector<16x32xf32> to vector<16x8xf32>
    %206 = vector.shape_cast %205 : vector<16x8xf32> to vector<2x8x8xf32>
    %207 = vector.extract_strided_slice %200 {offsets = [0, 24], sizes = [16, 8], strides = [1, 1]} : vector<16x32xf32> to vector<16x8xf32>
    %208 = vector.shape_cast %207 : vector<16x8xf32> to vector<2x8x8xf32>
    %209 = tpu.concatenate %202, %204, %206, %208 in 0 : vector<2x8x8xf32>, vector<2x8x8xf32>, vector<2x8x8xf32>, vector<2x8x8xf32> -> vector<8x8x8xf32>
    %210 = arith.truncf %209 : vector<8x8x8xf32> to vector<8x8x8xbf16>
    "tpu.trace_start"() <{level = 10 : i32, message = "gqe,gke->gqk"}> : () -> ()
    %cst_59 = arith.constant dense<0.000000e+00> : vector<8x8x8xf32>
    %211 = tpu.matmul %188, %199, %cst_59 {dimension_numbers = #tpu.dot_dimension_numbers<[2], [2], [1], [1], [0, 0, 0, 1, 1, 1], [0], [0]>} : vector<8x8x8xbf16>, vector<8x8x8xbf16>, vector<8x8x8xf32> -> vector<8x8x8xf32>
    "tpu.trace_stop"() : () -> ()
    %212 = vector.broadcast %12 : vector<1x8x8xf32> to vector<8x8x8xf32>
    %213 = arith.addf %211, %212 : vector<8x8x8xf32>
    %cst_60 = arith.constant dense<0xFF800000> : vector<8x8xf32>
    %214 = vector.multi_reduction <maximumf>, %213, %cst_60 [2] : vector<8x8x8xf32> to vector<8x8xf32>
    %215 = vector.shape_cast %214 : vector<8x8xf32> to vector<8x8x1xf32>
    %216 = vector.broadcast %215 : vector<8x8x1xf32> to vector<8x8x8xf32>
    %217 = arith.subf %213, %216 : vector<8x8x8xf32>
    %218 = math.exp %217 : vector<8x8x8xf32>
    %cst_61 = arith.constant dense<0.000000e+00> : vector<8x8xf32>
    %219 = vector.multi_reduction <add>, %218, %cst_61 [2] : vector<8x8x8xf32> to vector<8x8xf32>
    %220 = vector.shape_cast %219 : vector<8x8xf32> to vector<8x8x1xf32>
    %221 = tpu.reciprocal %220 {approx = true} : vector<8x8x1xf32> -> vector<8x8x1xf32>
    %222 = vector.broadcast %221 : vector<8x8x1xf32> to vector<8x8x8xf32>
    %223 = arith.mulf %218, %222 : vector<8x8x8xf32>
    %224 = arith.truncf %223 : vector<8x8x8xf32> to vector<8x8x8xbf16>
    "tpu.trace_start"() <{level = 10 : i32, message = "gqk,gke->gqe"}> : () -> ()
    %cst_62 = arith.constant dense<0.000000e+00> : vector<8x8x8xf32>
    %225 = tpu.matmul %224, %210, %cst_62 {dimension_numbers = #tpu.dot_dimension_numbers<[2], [1], [1], [2], [0, 0, 0, 1, 1, 2], [0], [0]>} : vector<8x8x8xbf16>, vector<8x8x8xbf16>, vector<8x8x8xf32> -> vector<8x8x8xf32>
    "tpu.trace_stop"() : () -> ()
    %226 = vector.extract_strided_slice %225 {offsets = [0, 0, 0], sizes = [2, 8, 8], strides = [1, 1, 1]} : vector<8x8x8xf32> to vector<2x8x8xf32>
    %227 = vector.shape_cast %226 : vector<2x8x8xf32> to vector<16x8xf32>
    %228 = arith.truncf %227 : vector<16x8xf32> to vector<16x8xbf16>
    %c1_63 = arith.constant 1 : index
    %c0_64 = arith.constant 0 : index
    %c0_65 = arith.constant 0 : index
    %c0_66 = arith.constant 0 : index
    %229 = vector.load %arg3[%c1_63, %c0_64, %c0_65, %c0_66] : memref<2x4x8x32xbf16, #tpu.memory_space<vmem>>, vector<1x1x8x32xbf16>
    %230 = vector.shape_cast %229 : vector<1x1x8x32xbf16> to vector<8x32xbf16>
    %cst_67 = arith.constant dense<0.000000e+00> : vector<16x32xf32>
    %231 = tpu.matmul %228, %230, %cst_67 {dimension_numbers = #tpu.dot_dimension_numbers<[1], [0], [0], [1], [0, 0, 1, 1], [], []>} : vector<16x8xbf16>, vector<8x32xbf16>, vector<16x32xf32> -> vector<16x32xf32>
    %232 = vector.broadcast %165 : vector<1x32xf32> to vector<16x32xf32>
    %233 = arith.addf %232, %231 : vector<16x32xf32>
    %234 = vector.extract_strided_slice %225 {offsets = [2, 0, 0], sizes = [2, 8, 8], strides = [1, 1, 1]} : vector<8x8x8xf32> to vector<2x8x8xf32>
    %235 = vector.shape_cast %234 : vector<2x8x8xf32> to vector<16x8xf32>
    %236 = arith.truncf %235 : vector<16x8xf32> to vector<16x8xbf16>
    %c1_68 = arith.constant 1 : index
    %c1_69 = arith.constant 1 : index
    %c0_70 = arith.constant 0 : index
    %c0_71 = arith.constant 0 : index
    %237 = vector.load %arg3[%c1_68, %c1_69, %c0_70, %c0_71] : memref<2x4x8x32xbf16, #tpu.memory_space<vmem>>, vector<1x1x8x32xbf16>
    %238 = vector.shape_cast %237 : vector<1x1x8x32xbf16> to vector<8x32xbf16>
    %cst_72 = arith.constant dense<0.000000e+00> : vector<16x32xf32>
    %239 = tpu.matmul %236, %238, %cst_72 {dimension_numbers = #tpu.dot_dimension_numbers<[1], [0], [0], [1], [0, 0, 1, 1], [], []>} : vector<16x8xbf16>, vector<8x32xbf16>, vector<16x32xf32> -> vector<16x32xf32>
    %240 = arith.addf %233, %239 : vector<16x32xf32>
    %241 = vector.extract_strided_slice %225 {offsets = [4, 0, 0], sizes = [2, 8, 8], strides = [1, 1, 1]} : vector<8x8x8xf32> to vector<2x8x8xf32>
    %242 = vector.shape_cast %241 : vector<2x8x8xf32> to vector<16x8xf32>
    %243 = arith.truncf %242 : vector<16x8xf32> to vector<16x8xbf16>
    %c1_73 = arith.constant 1 : index
    %c2_74 = arith.constant 2 : index
    %c0_75 = arith.constant 0 : index
    %c0_76 = arith.constant 0 : index
    %244 = vector.load %arg3[%c1_73, %c2_74, %c0_75, %c0_76] : memref<2x4x8x32xbf16, #tpu.memory_space<vmem>>, vector<1x1x8x32xbf16>
    %245 = vector.shape_cast %244 : vector<1x1x8x32xbf16> to vector<8x32xbf16>
    %cst_77 = arith.constant dense<0.000000e+00> : vector<16x32xf32>
    %246 = tpu.matmul %243, %245, %cst_77 {dimension_numbers = #tpu.dot_dimension_numbers<[1], [0], [0], [1], [0, 0, 1, 1], [], []>} : vector<16x8xbf16>, vector<8x32xbf16>, vector<16x32xf32> -> vector<16x32xf32>
    %247 = arith.addf %240, %246 : vector<16x32xf32>
    %248 = vector.extract_strided_slice %225 {offsets = [6, 0, 0], sizes = [2, 8, 8], strides = [1, 1, 1]} : vector<8x8x8xf32> to vector<2x8x8xf32>
    %249 = vector.shape_cast %248 : vector<2x8x8xf32> to vector<16x8xf32>
    %250 = arith.truncf %249 : vector<16x8xf32> to vector<16x8xbf16>
    %c1_78 = arith.constant 1 : index
    %c3_79 = arith.constant 3 : index
    %c0_80 = arith.constant 0 : index
    %c0_81 = arith.constant 0 : index
    %251 = vector.load %arg3[%c1_78, %c3_79, %c0_80, %c0_81] : memref<2x4x8x32xbf16, #tpu.memory_space<vmem>>, vector<1x1x8x32xbf16>
    %252 = vector.shape_cast %251 : vector<1x1x8x32xbf16> to vector<8x32xbf16>
    %cst_82 = arith.constant dense<0.000000e+00> : vector<16x32xf32>
    %253 = tpu.matmul %250, %252, %cst_82 {dimension_numbers = #tpu.dot_dimension_numbers<[1], [0], [0], [1], [0, 0, 1, 1], [], []>} : vector<16x8xbf16>, vector<8x32xbf16>, vector<16x32xf32> -> vector<16x32xf32>
    %254 = arith.addf %247, %253 : vector<16x32xf32>
    %255 = arith.addf %161, %254 : vector<16x32xf32>
    %cst_83 = arith.constant dense<0.000000e+00> : vector<16xf32>
    %256 = vector.multi_reduction <add>, %255, %cst_83 [1] : vector<16x32xf32> to vector<16xf32>
    %257 = vector.shape_cast %256 : vector<16xf32> to vector<16x1xf32>
    %cst_84 = arith.constant 3.200000e+01 : f32
    %258 = vector.broadcast %cst_84 : f32 to vector<16x1xf32>
    %259 = arith.divf %257, %258 : vector<16x1xf32>
    %260 = vector.broadcast %259 : vector<16x1xf32> to vector<16x32xf32>
    %261 = arith.subf %255, %260 : vector<16x32xf32>
    %262 = arith.mulf %261, %261 : vector<16x32xf32>
    %cst_85 = arith.constant dense<0.000000e+00> : vector<16xf32>
    %263 = vector.multi_reduction <add>, %262, %cst_85 [1] : vector<16x32xf32> to vector<16xf32>
    %264 = vector.shape_cast %263 : vector<16xf32> to vector<16x1xf32>
    %cst_86 = arith.constant 3.200000e+01 : f32
    %265 = vector.broadcast %cst_86 : f32 to vector<16x1xf32>
    %266 = arith.divf %264, %265 : vector<16x1xf32>
    %cst_87 = arith.constant 9.99999974E-6 : f32
    %267 = vector.broadcast %cst_87 : f32 to vector<16x1xf32>
    %268 = arith.addf %266, %267 : vector<16x1xf32>
    %269 = math.rsqrt %268 : vector<16x1xf32>
    %270 = vector.broadcast %269 : vector<16x1xf32> to vector<16x32xf32>
    %271 = arith.mulf %261, %270 : vector<16x32xf32>
    %272 = vector.broadcast %166 : vector<1x32xf32> to vector<16x32xf32>
    %273 = arith.mulf %271, %272 : vector<16x32xf32>
    %274 = vector.broadcast %167 : vector<1x32xf32> to vector<16x32xf32>
    %275 = arith.addf %273, %274 : vector<16x32xf32>
    %276 = arith.truncf %275 : vector<16x32xf32> to vector<16x32xbf16>
    %c1_88 = arith.constant 1 : index
    %c0_89 = arith.constant 0 : index
    %c0_90 = arith.constant 0 : index
    %277 = vector.load %arg4[%c1_88, %c0_89, %c0_90] : memref<2x32x64xbf16, #tpu.memory_space<vmem>>, vector<1x32x64xbf16>
    %278 = vector.shape_cast %277 : vector<1x32x64xbf16> to vector<32x64xbf16>
    %cst_91 = arith.constant dense<0.000000e+00> : vector<16x64xf32>
    %279 = tpu.matmul %276, %278, %cst_91 {dimension_numbers = #tpu.dot_dimension_numbers<[1], [0], [0], [1], [0, 0, 1, 1], [], []>} : vector<16x32xbf16>, vector<32x64xbf16>, vector<16x64xf32> -> vector<16x64xf32>
    %280 = vector.broadcast %168 : vector<1x64xf32> to vector<16x64xf32>
    %281 = arith.addf %279, %280 : vector<16x64xf32>
    %cst_92 = arith.constant 0.000000e+00 : f32
    %282 = vector.broadcast %cst_92 : f32 to vector<16x64xf32>
    %283 = arith.maximumf %281, %282 : vector<16x64xf32>
    %284 = arith.truncf %283 : vector<16x64xf32> to vector<16x64xbf16>
    %c1_93 = arith.constant 1 : index
    %c0_94 = arith.constant 0 : index
    %c0_95 = arith.constant 0 : index
    %285 = vector.load %arg5[%c1_93, %c0_94, %c0_95] : memref<2x64x32xbf16, #tpu.memory_space<vmem>>, vector<1x64x32xbf16>
    %286 = vector.shape_cast %285 : vector<1x64x32xbf16> to vector<64x32xbf16>
    %cst_96 = arith.constant dense<0.000000e+00> : vector<16x32xf32>
    %287 = tpu.matmul %284, %286, %cst_96 {dimension_numbers = #tpu.dot_dimension_numbers<[1], [0], [0], [1], [0, 0, 1, 1], [], []>} : vector<16x64xbf16>, vector<64x32xbf16>, vector<16x32xf32> -> vector<16x32xf32>
    %288 = vector.broadcast %169 : vector<1x32xf32> to vector<16x32xf32>
    %289 = arith.addf %287, %288 : vector<16x32xf32>
    %290 = arith.addf %275, %289 : vector<16x32xf32>
    %cst_97 = arith.constant dense<0.000000e+00> : vector<16xf32>
    %291 = vector.multi_reduction <add>, %290, %cst_97 [1] : vector<16x32xf32> to vector<16xf32>
    %292 = vector.shape_cast %291 : vector<16xf32> to vector<16x1xf32>
    %cst_98 = arith.constant 3.200000e+01 : f32
    %293 = vector.broadcast %cst_98 : f32 to vector<16x1xf32>
    %294 = arith.divf %292, %293 : vector<16x1xf32>
    %295 = vector.broadcast %294 : vector<16x1xf32> to vector<16x32xf32>
    %296 = arith.subf %290, %295 : vector<16x32xf32>
    %297 = arith.mulf %296, %296 : vector<16x32xf32>
    %cst_99 = arith.constant dense<0.000000e+00> : vector<16xf32>
    %298 = vector.multi_reduction <add>, %297, %cst_99 [1] : vector<16x32xf32> to vector<16xf32>
    %299 = vector.shape_cast %298 : vector<16xf32> to vector<16x1xf32>
    %cst_100 = arith.constant 3.200000e+01 : f32
    %300 = vector.broadcast %cst_100 : f32 to vector<16x1xf32>
    %301 = arith.divf %299, %300 : vector<16x1xf32>
    %cst_101 = arith.constant 9.99999974E-6 : f32
    %302 = vector.broadcast %cst_101 : f32 to vector<16x1xf32>
    %303 = arith.addf %301, %302 : vector<16x1xf32>
    %304 = math.rsqrt %303 : vector<16x1xf32>
    %305 = vector.broadcast %304 : vector<16x1xf32> to vector<16x32xf32>
    %306 = arith.mulf %296, %305 : vector<16x32xf32>
    %307 = vector.broadcast %170 : vector<1x32xf32> to vector<16x32xf32>
    %308 = arith.mulf %306, %307 : vector<16x32xf32>
    %309 = vector.broadcast %171 : vector<1x32xf32> to vector<16x32xf32>
    %310 = arith.addf %308, %309 : vector<16x32xf32>
    %311 = arith.truncf %310 : vector<16x32xf32> to vector<16x32xbf16>
    %c0_102 = arith.constant 0 : index
    %c0_103 = arith.constant 0 : index
    %312 = vector.load %arg7[%c0_102, %c0_103] : memref<32x128xbf16, #tpu.memory_space<vmem>>, vector<32x128xbf16>
    %cst_104 = arith.constant dense<0.000000e+00> : vector<16x128xf32>
    %313 = tpu.matmul %311, %312, %cst_104 {dimension_numbers = #tpu.dot_dimension_numbers<[1], [0], [0], [1], [0, 0, 1, 1], [], []>} : vector<16x32xbf16>, vector<32x128xbf16>, vector<16x128xf32> -> vector<16x128xf32>
    %c0_105 = arith.constant 0 : index
    %c0_106 = arith.constant 0 : index
    %314 = vector.load %arg8[%c0_105, %c0_106] : memref<1x128xf32, #tpu.memory_space<vmem>>, vector<1x128xf32>
    %315 = vector.broadcast %314 : vector<1x128xf32> to vector<16x128xf32>
    %316 = arith.addf %313, %315 : vector<16x128xf32>
    %317 = vector.shape_cast %316 : vector<16x128xf32> to vector<2x8x128xf32>
    %c0_107 = arith.constant 0 : index
    %c0_108 = arith.constant 0 : index
    %c0_109 = arith.constant 0 : index
    %318 = vector.load %arg9[%c0_107, %c0_108, %c0_109] : memref<2x8x128xf32, #tpu.memory_space<vmem>>, vector<2x8x128xf32>
    tpu.vector_store %arg9[%c0_107, %c0_108, %c0_109], %317 {strides = array<i32>} : memref<2x8x128xf32, #tpu.memory_space<vmem>>, vector<2x8x128xf32>,
    return
  }
}

</mosaic_0001>

<bundles_post_ra>
// kernel: transformer_forward.1
= control target key start
LH: loop header
LB: loop body
LE: loop exit
PB: predicated region body
PF: predicated region fallthrough
CT: control target
= control target key end

     0   :  { %v3574_v0 = vmov 0.0   ;;  %vm3575_vm0 = vmmov 0   ;;  %vm66_vm1 = vcmask 261120   ;;  %v38_v9 = vlaneseq  ;;  %s3576_s19 = smov 104   ;;  %s3577_s20 = smov 120   ;;  %s4296_s2 = inlined_call_operand.vmem [shape: bf16[2,32,96], index: 2, kind: input, shape index: {}]   ;;  %s4297_s0 = inlined_call_operand.vmem [shape: f32[2,8,32], index: 0, kind: input, shape index: {}]   ;;  %s4298_s1 = inlined_call_operand.vmem [shape: f32[8,32], index: 1, kind: input, shape index: {}]   ;;  %s4299_s6 = inlined_call_operand.vmem [shape: f32[2,8,128], index: 6, kind: input, shape index: {}]   ;;  %s4300_s3 = inlined_call_operand.vmem [shape: bf16[2,4,8,32], index: 3, kind: input, shape index: {}]   ;;  %s4301_s4 = inlined_call_operand.vmem [shape: bf16[2,32,64], index: 4, kind: input, shape index: {}]   ;;  %s4302_s5 = inlined_call_operand.vmem [shape: bf16[2,64,32], index: 5, kind: input, shape index: {}]   ;;  %s4303_s7 = inlined_call_operand.vmem [shape: bf16[32,128], index: 7, kind: input, shape index: {}]   ;;  %s4304_s8 = inlined_call_operand.vmem [shape: f32[1,128], index: 8, kind: input, shape index: {}]   ;;  %s4305_s9 = inlined_call_operand.vmem [shape: f32[2,8,128], index: 9, kind: output, shape index: {}]  }
   0x1   :  { %3133 = vmatprep.subr.bf16.mxu0 %v3574_v0  ;;  %v3475_v1 = vld [vmem:[%s4296_s2] sm:$0xff]   ;;  %3137 = vmatprep.mubr.msk.bf16.mxu0 %vm3575_vm0, %v3574_v0  ;;  %v3476_v2 = vld [vmem:[%s4296_s2 + $0x8] sm:$0xff]   ;;  %s3578_s21 = smov 96   ;;  %s3579_s22 = smov 112   ;;  %vm142_vm2 = vcmask 64512   ;;  %vm633_vm3 = vcmask 1043456  }
   0x2   :  { %3141 = vmatprep.subr.bf16.mxu1 %v3574_v0  ;;  %3143 = vmatprep.mubr.msk.bf16.mxu1 %vm3575_vm0, %v3574_v0  ;;  %v33_v3 = vld [vmem:[%s4297_s0] sm:$0xff]  ;;  %v34_v4 = vld [vmem:[%s4297_s0 + $0x8] sm:$0xff]  ;;  %v3665_v10 = vshrl.u32 %v38_v9, 7  ;;  %s3580_s23 = smov 64   ;;  %v41_v58 = vand.u32 127, %v38_v9  ;;  %vm1369_vm5 = vcmask 523264  }
   0x3   :  { %3134 = vmatpush3.bf16.msra.mxu0 %v3475_v1  ;;  %v35_v5 = vld [vmem:[%s4298_s1] sm:$0xff]  ;;  %v3581_v59 = vmov -1e+30  }
   0x4   :  { %3135 = vmatprep.subr.bf16.mxu0 %v3574_v0  ;;  %v3654_v6 = vadd.f32 %v35_v5, %v33_v3  ;;  %v3656_v7 = vadd.f32 %v35_v5, %v34_v4  ;;  %v52_v11 = vsub.s32 0, %v3665_v10  ;;  %v3671_v12 = vld [vmem:[%s4299_s6] sm:$0xff]  ;;  %vm42_vm4 = vcmp.ge.s32.totalorder %v3665_v10, %v41_v58 }
   0x5   :  { %v3759_v60 = vsel %vm42_vm4, 0.0, %v3581_v59 }
   0x6   :  { %v45_v8 = vpack.c.bf16 %v3656_v7, %v3654_v6  ;;  %v53_v13 = vrot.slane %v3671_v12, %v52_v11 }
   0x7   :  { %3136 = vmatpush3.bf16.msra.mxu0 %v3476_v2 }
   0x8   :  { %3147 = vmatprep.subr.bf16.mxu0 %v3574_v0 }
   0xa   :  { %3138 = vmatmul.mubr.msk.bf16.vlgmr.msra.gmra.mrb[0].mxu0 %vm66_vm1, %v45_v8 }
   0xb   :  { %3149 = vmatprep.mubr.msk.bf16.mxu0 %vm3575_vm0, %v3574_v0 }
  0xdd   :  { %v104_v14 = vpop.f32.mrb[0].mxu0 }
  0xde   :  { %v3139_v15 = vpop.f32.mrb[1].mxu0  ;;  %v105_v17 = vadd.f32 %v104_v14, %v53_v13 }
  0xdf   :  { %v107_v16 = vpop.f32.mrb[2].mxu0 }
  0xe0   :  { %v108_v18 = vadd.f32 %v107_v16, %v53_v13  ;;  %v3140_v19 = vpop.f32.mrb[3].mxu0  ;;  %v131_v21 = vpack.c.bf16 %v105_v17, %v105_v17 }
  0xe2   :  { %v3455_v20 = vpack.i.bf16 %v108_v18, %v105_v17  ;;  %v132_v22 = vpack.c.bf16 %v108_v18, %v108_v18 }
  0xe4   :  { %3456 = vrot.lane.b32.xlu1 %v3455_v20, %s3576_s19  ;;  %3446 = vrot.lane.b32.xlu0 %v3455_v20, %s3577_s20 }
  0xe8   :  { %140 = vrot.lane.b32.xlu1 %v131_v21, %s3578_s21  ;;  %3451 = vrot.lane.b32.xlu0 %v3455_v20, %s3579_s22 }
  0xec   :  { %190 = vrot.lane.b32.xlu0 %v132_v22, %s3578_s21 }
 0x156   :  { %v3457_v23 = vpop.permute.xlu1 %3456  ;;  %v3447_v24 = vpop.permute.xlu0 %3446 }
 0x157   :  { %v3449_v25 = vunpack.i.h.bf16 %v3447_v24  ;;  %v3448_v26 = vunpack.i.l.bf16 %v3447_v24  ;;  %v3458_v34 = vunpack.i.l.bf16 %v3457_v23  ;;  %v3459_v37 = vunpack.i.h.bf16 %v3457_v23 }
 0x159   :  { %v3681_v27 = vpack.c.bf16 %v3449_v25, %v3449_v25  ;;  %v3683_v28 = vpack.c.bf16 %v3448_v26, %v3448_v26  ;;  %v3700_v40 = vpack.c.bf16 %v3458_v34, %v3458_v34  ;;  %v3703_v41 = vpack.c.bf16 %v3459_v37, %v3459_v37 }
 0x15a   :  { %v141_v29 = vpop.permute.xlu1 %140  ;;  %v3452_v30 = vpop.permute.xlu0 %3451 }
 0x15b   :  { %v3454_v31 = vunpack.i.h.bf16 %v3452_v30  ;;  %v3453_v32 = vunpack.i.l.bf16 %v3452_v30  ;;  %239 = vrot.lane.b32.xlu1 %v3683_v28, %s3578_s21  ;;  %288 = vrot.lane.b32.xlu0 %v3681_v27, %s3578_s21  ;;  %v147_v33 = vsel %vm142_vm2, %v141_v29, 0 }
 0x15c   :  { %3142 = vmatpush3.bf16.xpose.msra.mxu1 %v147_v33 }
 0x15d   :  { %v3690_v35 = vpack.c.bf16 %v3454_v31, %v3454_v31  ;;  %v3692_v36 = vpack.c.bf16 %v3453_v32, %v3453_v32  ;;  %3153 = vmatprep.subr.bf16.mxu1 %v3574_v0 }
 0x15e   :  { %v191_v38 = vpop.permute.xlu0 %190 }
 0x15f   :  { %v196_v39 = vsel %vm142_vm2, %v191_v38, 0  ;;  %337 = vrot.lane.b32.xlu1 %v3692_v36, %s3578_s21  ;;  %386 = vrot.lane.b32.xlu0 %v3690_v35, %s3578_s21 }
 0x160   :  { %3148 = vmatpush3.bf16.xpose.msra.mxu0 %v196_v39 }
 0x161   :  { %3159 = vmatprep.subr.bf16.mxu0 %v3574_v0 }
 0x163   :  { %3144 = vmatmul.mubr.msk.bf16.vlgmr.msra.gmra.mrb[0].mxu1 %vm142_vm2, %v131_v21  ;;  %435 = vrot.lane.b32.xlu1 %v3700_v40, %s3578_s21 }
 0x164   :  { %484 = vrot.lane.b32.xlu0 %v3703_v41, %s3578_s21  ;;  %3155 = vmatprep.mubr.msk.bf16.mxu1 %vm3575_vm0, %v3574_v0 }
 0x167   :  { %677 = vrot.lane.b32.xlu1 %v132_v22, %s3580_s23  ;;  %3150 = vmatmul.mubr.msk.bf16.vlgmr.msra.gmra.mrb[4].mxu0 %vm142_vm2, %v132_v22 }
 0x168   :  { %628 = vrot.lane.b32.xlu0 %v131_v21, %s3580_s23  ;;  %3161 = vmatprep.mubr.msk.bf16.mxu0 %vm3575_vm0, %v3574_v0 }
 0x1cd   :  { %v240_v42 = vpop.permute.xlu1 %239  ;;  %v289_v43 = vpop.permute.xlu0 %288 }
 0x1ce   :  { %v245_v44 = vsel %vm142_vm2, %v240_v42, 0  ;;  %v294_v45 = vsel %vm142_vm2, %v289_v43, 0 }
 0x1cf   :  { %3154 = vmatpush3.bf16.xpose.msra.mxu1 %v245_v44  ;;  %3160 = vmatpush3.bf16.xpose.msra.mxu0 %v294_v45 }
 0x1d0   :  { %3165 = vmatprep.subr.bf16.mxu1 %v3574_v0  ;;  %3171 = vmatprep.subr.bf16.mxu0 %v3574_v0 }
 0x1d1   :  { %v338_v46 = vpop.permute.xlu1 %337  ;;  %v387_v47 = vpop.permute.xlu0 %386 }
 0x1d2   :  { %v343_v48 = vsel %vm142_vm2, %v338_v46, 0  ;;  %v392_v49 = vsel %vm142_vm2, %v387_v47, 0 }
 0x1d5   :  { %v436_v50 = vpop.permute.xlu1 %435 }
 0x1d6   :  { %3156 = vmatmul.mubr.msk.bf16.vlgmr.msra.gmra.mrb[4].mxu1 %vm142_vm2, %v3683_v28  ;;  %3162 = vmatmul.mubr.msk.bf16.vlgmr.msra.gmra.mrb[8].mxu0 %vm142_vm2, %v3681_v27  ;;  %v485_v51 = vpop.permute.xlu0 %484  ;;  %v441_v52 = vsel %vm142_vm2, %v436_v50, 0 }
 0x1d7   :  { %3166 = vmatpush3.bf16.xpose.msra.mxu1 %v343_v48  ;;  %3172 = vmatpush3.bf16.xpose.msra.mxu0 %v392_v49  ;;  %v490_v53 = vsel %vm142_vm2, %v485_v51, 0 }
 0x1d8   :  { %3167 = vmatprep.mubr.msk.bf16.mxu1 %vm3575_vm0, %v3574_v0  ;;  %3173 = vmatprep.mubr.msk.bf16.mxu0 %vm3575_vm0, %v3574_v0 }
 0x1d9   :  { %3177 = vmatprep.subr.bf16.mxu1 %v3574_v0  ;;  %3183 = vmatprep.subr.bf16.mxu0 %v3574_v0  ;;  %v678_v54 = vpop.permute.xlu1 %677 }
 0x1da   :  { %v629_v55 = vpop.permute.xlu0 %628  ;;  %v683_v56 = vsel %vm633_vm3, %v678_v54, 0 }
 0x1db   :  { %v635_v57 = vsel %vm633_vm3, %v629_v55, 0 }
 0x1de   :  { %3168 = vmatmul.mubr.msk.bf16.vlgmr.msra.gmra.mrb[8].mxu1 %vm142_vm2, %v3692_v36  ;;  %3174 = vmatmul.mubr.msk.bf16.vlgmr.msra.gmra.mrb[12].mxu0 %vm142_vm2, %v3690_v35 }
 0x1df   :  { %3178 = vmatpush3.bf16.xpose.msra.mxu1 %v441_v52  ;;  %3184 = vmatpush3.bf16.xpose.msra.mxu0 %v490_v53 }
 0x1e0   :  { %3179 = vmatprep.mubr.msk.bf16.mxu1 %vm3575_vm0, %v3574_v0  ;;  %3185 = vmatprep.mubr.msk.bf16.mxu0 %vm3575_vm0, %v3574_v0 }
 0x1e1   :  { %3189 = vmatprep.subr.bf16.mxu1 %v3574_v0  ;;  %3195 = vmatprep.subr.bf16.mxu0 %v3574_v0 }
 0x1e6   :  { %3180 = vmatmul.mubr.msk.bf16.vlgmr.msra.gmra.mrb[12].mxu1 %vm142_vm2, %v3700_v40  ;;  %3186 = vmatmul.mubr.msk.bf16.vlgmr.msra.gmra.mrb[16].mxu0 %vm142_vm2, %v3703_v41 }
 0x1e7   :  { %3190 = vmatpush3.bf16.msra.mxu1 %v635_v57  ;;  %3196 = vmatpush3.bf16.msra.mxu0 %v683_v56 }
 0x1e8   :  { %3191 = vmatprep.mubr.msk.bf16.mxu1 %vm3575_vm0, %v3574_v0  ;;  %3197 = vmatprep.mubr.msk.bf16.mxu0 %vm3575_vm0, %v3574_v0 }
 0x1e9   :  { %3201 = vmatprep.subr.bf16.mxu1 %v3574_v0  ;;  %3207 = vmatprep.subr.bf16.mxu0 %v3574_v0 }
 0x236   :  { %v183_v61 = vpop.f32.mrb[0].mxu1 }
 0x237   :  { %v184_v62 = vadd.f32 %v183_v61, %v3759_v60  ;;  %v3145_v63 = vpop.f32.mrb[1].mxu1 }
 0x238   :  { %v186_v1 = vpop.f32.mrb[2].mxu1 }
 0x239   :  { %v3146_v2 = vpop.f32.mrb[3].mxu1  ;;  %v532_v3 = vsel %vm142_vm2, %v184_v62, -inf }
 0x23a   :  { %533 = vmax.xlane.f32.xlu1 %v532_v3  ;;  %v232_v4 = vpop.f32.mrb[4].mxu0 }
 0x23b   :  { %v233_v5 = vadd.f32 %v232_v4, %v3759_v60  ;;  %v3151_v8 = vpop.f32.mrb[5].mxu0 }
 0x23c   :  { %v235_v13 = vpop.f32.mrb[6].mxu0 }
 0x23d   :  { %v3152_v9 = vpop.f32.mrb[7].mxu0  ;;  %v535_v14 = vsel %vm142_vm2, %v233_v5, -inf }
 0x23e   :  { %536 = vmax.xlane.f32.xlu0 %v535_v14 }
 0x2a9   :  { %v281_v15 = vpop.f32.mrb[4].mxu1  ;;  %v330_v16 = vpop.f32.mrb[8].mxu0 }
 0x2aa   :  { %v282_v17 = vadd.f32 %v281_v15, %v3759_v60  ;;  %v331_v18 = vadd.f32 %v330_v16, %v3759_v60  ;;  %v3157_v19 = vpop.f32.mrb[5].mxu1  ;;  %v3163_v20 = vpop.f32.mrb[9].mxu0 }
 0x2ab   :  { %v284_v21 = vpop.f32.mrb[6].mxu1  ;;  %v333_v22 = vpop.f32.mrb[10].mxu0 }
 0x2ac   :  { %v3158_v23 = vpop.f32.mrb[7].mxu1  ;;  %v3164_v24 = vpop.f32.mrb[11].mxu0  ;;  %v538_v25 = vsel %vm142_vm2, %v282_v17, -inf  ;;  %v541_v26 = vsel %vm142_vm2, %v331_v18, -inf }
 0x2ad   :  { %539 = vmax.xlane.f32.xlu0 %v538_v25  ;;  %542 = vmax.xlane.f32.xlu1 %v541_v26 }
 0x2b1   :  { %v379_v29 = vpop.f32.mrb[8].mxu1  ;;  %v428_v30 = vpop.f32.mrb[12].mxu0 }
 0x2b2   :  { %v3770_v31 = vadd.f32 %v379_v29, %v3759_v60  ;;  %v429_v32 = vadd.f32 %v428_v30, %v3759_v60  ;;  %v3169_v33 = vpop.f32.mrb[9].mxu1  ;;  %v3175_v34 = vpop.f32.mrb[13].mxu0 }
 0x2b3   :  { %v382_v37 = vpop.f32.mrb[10].mxu1  ;;  %v431_v38 = vpop.f32.mrb[14].mxu0 }
 0x2b4   :  { %v3170_v39 = vpop.f32.mrb[11].mxu1  ;;  %v3176_v42 = vpop.f32.mrb[15].mxu0  ;;  %v544_v43 = vsel %vm142_vm2, %v3770_v31, -inf  ;;  %v547_v44 = vsel %vm142_vm2, %v429_v32, -inf }
 0x2b5   :  { %545 = vmax.xlane.f32.xlu0 %v544_v43  ;;  %548 = vmax.xlane.f32.xlu1 %v547_v44 }
 0x2b9   :  { %v477_v45 = vpop.f32.mrb[12].mxu1  ;;  %v526_v46 = vpop.f32.mrb[16].mxu0 }
 0x2ba   :  { %v3777_v47 = vadd.f32 %v477_v45, %v3759_v60  ;;  %v527_v48 = vadd.f32 %v526_v46, %v3759_v60  ;;  %v3181_v49 = vpop.f32.mrb[13].mxu1  ;;  %v3187_v50 = vpop.f32.mrb[17].mxu0 }
 0x2bb   :  { %v480_v51 = vpop.f32.mrb[14].mxu1  ;;  %v529_v52 = vpop.f32.mrb[18].mxu0 }
 0x2bc   :  { %v3182_v53 = vpop.f32.mrb[15].mxu1  ;;  %v3188_v54 = vpop.f32.mrb[19].mxu0  ;;  %v550_v55 = vsel %vm142_vm2, %v3777_v47, -inf  ;;  %v553_v56 = vsel %vm142_vm2, %v527_v48, -inf }
 0x2bd   :  { %551 = vmax.xlane.f32.xlu0 %v550_v55  ;;  %554 = vmax.xlane.f32.xlu1 %v553_v56 }
 0x2c7   :  { %v534_v57 = vpop.xlane.xlu1 %533 }
 0x2c8   :  { %v556_v59 = vsub.f32 %v184_v62, %v534_v57 }
 0x2ca   :  { %v564_v63 = vmul.f32 1.442695, %v556_v59 }
 0x2cb   :  { %v537_v58 = vpop.xlane.xlu0 %536 }
 0x2cc   :  { %v557_v61 = vsub.f32 %v233_v5, %v537_v58  ;;  %3493 = vpow2.f32 %v564_v63 }
 0x2ce   :  { %725 = vrot.lane.b32.xlu1 %v3683_v28, %s3580_s23  ;;  %v566_v1 = vmul.f32 1.442695, %v557_v61 }
 0x2d0   :  { %3495 = vpow2.f32 %v566_v1 }
 0x2d3   :  { %773 = vrot.lane.b32.xlu0 %v3681_v27, %s3580_s23 }
 0x2d6   :  { %v3494_v2 = vpop.eup %3493 }
 0x2d7   :  { %v580_v4 = vsel %vm142_vm2, %v3494_v2, 0.0 }
 0x2da   :  { %v3496_v3 = vpop.eup %3495 }
 0x2db   :  { %v583_v8 = vsel %vm142_vm2, %v3496_v3, 0.0 }
 0x2f2   :  { %581 = vadd.xlane.f32.xlu0 %v580_v4  ;;  %584 = vadd.xlane.f32.xlu1 %v583_v8 }
 0x303   :  { %821 = vrot.lane.b32.xlu1 %v3692_v36, %s3580_s23 }
 0x33a   :  { %v540_v27 = vpop.xlane.xlu0 %539  ;;  %v543_v28 = vpop.xlane.xlu1 %542 }
 0x33b   :  { %v558_v13 = vsub.f32 %v282_v17, %v540_v27  ;;  %v559_v62 = vsub.f32 %v331_v18, %v543_v28 }
 0x33d   :  { %v568_v5 = vmul.f32 1.442695, %v558_v13  ;;  %v570_v9 = vmul.f32 1.442695, %v559_v62 }
 0x33f   :  { %3497 = vpow2.f32 %v568_v5 }
 0x340   :  { %3499 = vpow2.f32 %v570_v9 }
 0x342   :  { %v549_v14 = vpop.xlane.xlu1 %548  ;;  %v546_v29 = vpop.xlane.xlu0 %545 }
 0x343   :  { %v561_v15 = vsub.f32 %v429_v32, %v549_v14  ;;  %v560_v30 = vsub.f32 %v3770_v31, %v546_v29 }
 0x345   :  { %v574_v16 = vmul.f32 1.442695, %v561_v15  ;;  %v572_v33 = vmul.f32 1.442695, %v560_v30 }
 0x347   :  { %3501 = vpow2.f32 %v574_v16 }
 0x349   :  { %v3791_v19 = vpop.eup %3497 }
 0x34a   :  { %v3793_v20 = vpop.eup %3499  ;;  %v555_v21 = vpop.xlane.xlu1 %554  ;;  %v586_v36 = vsel %vm142_vm2, %v3791_v19, 0.0 }
 0x34b   :  { %v563_v22 = vsub.f32 %v527_v48, %v555_v21  ;;  %587 = vadd.xlane.f32.xlu0 %v586_v36  ;;  %v589_v17 = vsel %vm142_vm2, %v3793_v20, 0.0  ;;  %v552_v32 = vpop.xlane.xlu0 %551 }
 0x34c   :  { %590 = vadd.xlane.f32.xlu1 %v589_v17  ;;  %v562_v34 = vsub.f32 %v3777_v47, %v552_v32 }
 0x34d   :  { %v578_v18 = vmul.f32 1.442695, %v563_v22 }
 0x34e   :  { %v576_v37 = vmul.f32 1.442695, %v562_v34  ;;  %v726_v39 = vpop.permute.xlu1 %725 }
 0x34f   :  { %3503 = vpow2.f32 %v578_v18  ;;  %v774_v38 = vpop.permute.xlu0 %773  ;;  %v731_v51 = vsel %vm633_vm3, %v726_v39, 0 }
 0x350   :  { %3505 = vpow2.f32 %v572_v33  ;;  %v779_v52 = vsel %vm633_vm3, %v774_v38, 0 }
 0x351   :  { %v3799_v23 = vpop.eup %3501  ;;  %3507 = vpow2.f32 %v576_v37 }
 0x352   :  { %v595_v24 = vsel %vm142_vm2, %v3799_v23, 0.0 }
 0x353   :  { %596 = vadd.xlane.f32.xlu1 %v595_v24 }
 0x359   :  { %v3803_v25 = vpop.eup %3503 }
 0x35a   :  { %v601_v26 = vsel %vm142_vm2, %v3803_v25, 0.0  ;;  %v3813_v42 = vpop.eup %3505 }
 0x35b   :  { %602 = vadd.xlane.f32.xlu1 %v601_v26  ;;  %v3817_v31 = vpop.eup %3507  ;;  %v2958_v26 = vld [vmem:[%s4300_s3 + $0x4] sm:$0xf] }
 0x35c   :  { %v1075_v29 = vsel %vm633_vm3, %v2958_v26, 0 }
 0x361   :  { %869 = vrot.lane.b32.xlu0 %v3690_v35, %s3580_s23  ;;  %v592_v35 = vsel %vm142_vm2, %v3813_v42, 0.0 }
 0x36c   :  { %917 = vrot.lane.b32.xlu1 %v3700_v40, %s3580_s23  ;;  %v598_v40 = vsel %vm142_vm2, %v3817_v31, 0.0 }
 0x37f   :  { %v582_v43 = vpop.xlane.xlu0 %581  ;;  %v585_v44 = vpop.xlane.xlu1 %584 }
 0x380   :  { %3509 = vrcp.f32 %v582_v43  ;;  %593 = vadd.xlane.f32.xlu0 %v592_v35 }
 0x381   :  { %3511 = vrcp.f32 %v585_v44  ;;  %v2960_v44 = vld [vmem:[%s4300_s3 + $0x8] sm:$0xf] }
 0x382   :  { %v1127_v35 = vsel %vm633_vm3, %v2960_v44, 0 }
 0x383   :  { %v822_v53 = vpop.permute.xlu1 %821 }
 0x384   :  { %599 = vadd.xlane.f32.xlu0 %v598_v40 }
 0x38a   :  { %v3510_v45 = vpop.eup %3509 }
 0x38b   :  { %v3512_v46 = vpop.eup %3511  ;;  %v612_v47 = vmul.f32 %v3510_v45, %v3494_v2 }
 0x38c   :  { %v613_v48 = vmul.f32 %v3512_v46, %v3496_v3  ;;  %v827_v3 = vsel %vm633_vm3, %v822_v53, 0 }
 0x38d   :  { %v620_v49 = vpack.c.bf16 %v612_v47, %v612_v47 }
 0x38e   :  { %v621_v50 = vpack.c.bf16 %v613_v48, %v613_v48 }
 0x38f   :  { %3192 = vmatmul.mubr.msk.bf16.vlgmr.msra.gmra.mrb[16].mxu1 %vm142_vm2, %v620_v49 }
 0x390   :  { %3198 = vmatmul.mubr.msk.bf16.vlgmr.msra.gmra.mrb[20].mxu0 %vm142_vm2, %v621_v50  ;;  %3202 = vmatpush3.bf16.msra.mxu1 %v731_v51 }
 0x391   :  { %3208 = vmatpush3.bf16.msra.mxu0 %v779_v52  ;;  %3203 = vmatprep.mubr.msk.bf16.mxu1 %vm3575_vm0, %v3574_v0 }
 0x392   :  { %3209 = vmatprep.mubr.msk.bf16.mxu0 %vm3575_vm0, %v3574_v0  ;;  %3213 = vmatprep.subr.bf16.mxu1 %v3574_v0 }
 0x393   :  { %3219 = vmatprep.subr.bf16.mxu0 %v3574_v0 }
 0x39a   :  { %965 = vrot.lane.b32.xlu0 %v3703_v41, %s3580_s23 }
 0x3d8   :  { %v588_v54 = vpop.xlane.xlu0 %587 }
 0x3d9   :  { %3513 = vrcp.f32 %v588_v54  ;;  %v591_v55 = vpop.xlane.xlu1 %590 }
 0x3da   :  { %3515 = vrcp.f32 %v591_v55 }
 0x3dc   :  { %v870_v63 = vpop.permute.xlu0 %869 }
 0x3dd   :  { %v875_v41 = vsel %vm633_vm3, %v870_v63, 0 }
 0x3e0   :  { %v597_v56 = vpop.xlane.xlu1 %596 }
 0x3e1   :  { %3517 = vrcp.f32 %v597_v56 }
 0x3e3   :  { %v3514_v57 = vpop.eup %3513 }
 0x3e4   :  { %v3516_v58 = vpop.eup %3515  ;;  %v614_v59 = vmul.f32 %v3514_v57, %v3791_v19 }
 0x3e5   :  { %v615_v61 = vmul.f32 %v3516_v58, %v3793_v20 }
 0x3e6   :  { %v622_v1 = vpack.c.bf16 %v614_v59, %v614_v59 }
 0x3e7   :  { %v623_v2 = vpack.c.bf16 %v615_v61, %v615_v61 }
 0x3e8   :  { %3204 = vmatmul.mubr.msk.bf16.vlgmr.msra.gmra.mrb[20].mxu1 %vm142_vm2, %v622_v1  ;;  %v603_v28 = vpop.xlane.xlu1 %602 }
 0x3e9   :  { %3210 = vmatmul.mubr.msk.bf16.vlgmr.msra.gmra.mrb[24].mxu0 %vm142_vm2, %v623_v2  ;;  %3214 = vmatpush3.bf16.msra.mxu1 %v827_v3  ;;  %3519 = vrcp.f32 %v603_v28 }
 0x3ea   :  { %3220 = vmatpush3.bf16.msra.mxu0 %v875_v41  ;;  %3221 = vmatprep.mubr.msk.bf16.mxu0 %vm3575_vm0, %v3574_v0 }
 0x3eb   :  { %3231 = vmatprep.subr.bf16.mxu0 %v3574_v0  ;;  %3215 = vmatprep.mubr.msk.bf16.mxu1 %vm3575_vm0, %v3574_v0  ;;  %v3518_v4 = vpop.eup %3517 }
 0x3ec   :  { %3225 = vmatprep.subr.bf16.mxu1 %v3574_v0  ;;  %v617_v8 = vmul.f32 %v3518_v4, %v3799_v23  ;;  %v918_v21 = vpop.permute.xlu1 %917  ;;  %v1014_v23 = vld [vmem:[%s4300_s3] sm:$0xf] }
 0x3ed   :  { %v923_v17 = vsel %vm633_vm3, %v918_v21, 0 }
 0x3ee   :  { %v625_v27 = vpack.c.bf16 %v617_v8, %v617_v8 }
 0x3f1   :  { %3222 = vmatmul.mubr.msk.bf16.vlgmr.msra.gmra.mrb[28].mxu0 %vm142_vm2, %v625_v27 }
 0x3f2   :  { %3233 = vmatprep.mubr.msk.bf16.mxu0 %vm3575_vm0, %v3574_v0 }
 0x3f3   :  { %v3520_v62 = vpop.eup %3519 }
 0x3f4   :  { %v619_v9 = vmul.f32 %v3520_v62, %v3803_v25  ;;  %v1019_v25 = vsel %vm633_vm3, %v1014_v23, 0 }
 0x3f6   :  { %v627_v19 = vpack.c.bf16 %v619_v9, %v619_v9 }
 0x40d   :  { %v594_v13 = vpop.xlane.xlu0 %593 }
 0x40e   :  { %3521 = vrcp.f32 %v594_v13 }
 0x411   :  { %v600_v5 = vpop.xlane.xlu0 %599 }
 0x412   :  { %3523 = vrcp.f32 %v600_v5 }
 0x415   :  { %v966_v14 = vpop.permute.xlu0 %965 }
 0x416   :  { %v971_v15 = vsel %vm633_vm3, %v966_v14, 0 }
 0x417   :  { %3232 = vmatpush3.bf16.msra.mxu0 %v971_v15 }
 0x418   :  { %v3522_v16 = vpop.eup %3521  ;;  %3243 = vmatprep.subr.bf16.mxu0 %v3574_v0 }
 0x419   :  { %v616_v20 = vmul.f32 %v3522_v16, %v3813_v42  ;;  %v1064_v16 = vsub.s32 1, %v3665_v10 }
 0x41a   :  { %3234 = vmatmul.mubr.msk.bf16.vlgmr.msra.gmra.mrb[32].mxu0 %vm142_vm2, %v627_v19 }
 0x41b   :  { %v624_v36 = vpack.c.bf16 %v616_v20, %v616_v20  ;;  %3245 = vmatprep.mubr.msk.bf16.mxu0 %vm3575_vm0, %v3574_v0  ;;  %3244 = vmatpush3.bf16.msra.mxu0 %v1075_v29  ;;  %v1065_v19 = vrot.slane %v3671_v12, %v1064_v16 }
 0x41c   :  { %v3524_v22 = vpop.eup %3523  ;;  %3255 = vmatprep.subr.bf16.mxu0 %v3574_v0 }
 0x41d   :  { %3216 = vmatmul.mubr.msk.bf16.vlgmr.msra.gmra.mrb[24].mxu1 %vm142_vm2, %v624_v36  ;;  %v618_v18 = vmul.f32 %v3524_v22, %v3817_v31  ;;  %v2962_v31 = vld [vmem:[%s4300_s3 + $0xc] sm:$0xf] }
 0x41e   :  { %3226 = vmatpush3.bf16.msra.mxu1 %v923_v17  ;;  %3227 = vmatprep.mubr.msk.bf16.mxu1 %vm3575_vm0, %v3574_v0  ;;  %v1179_v50 = vsel %vm633_vm3, %v2962_v31, 0 }
 0x41f   :  { %3237 = vmatprep.subr.bf16.mxu1 %v3574_v0  ;;  %v626_v24 = vpack.c.bf16 %v618_v18, %v618_v18 }
 0x425   :  { %3228 = vmatmul.mubr.msk.bf16.vlgmr.msra.gmra.mrb[28].mxu1 %vm142_vm2, %v626_v24 }
 0x426   :  { %3238 = vmatpush3.bf16.msra.mxu1 %v1019_v25  ;;  %3239 = vmatprep.mubr.msk.bf16.mxu1 %vm3575_vm0, %v3574_v0 }
 0x427   :  { %3249 = vmatprep.subr.bf16.mxu1 %v3574_v0 }
 0x462   :  { %v671_v30 = vpop.f32.mrb[16].mxu1 }
 0x463   :  { %v719_v32 = vpop.f32.mrb[20].mxu0  ;;  %v3193_v33 = vpop.f32.mrb[17].mxu1 }
 0x464   :  { %v1013_v34 = vpack.c.bf16 %v719_v32, %v671_v30  ;;  %v3199_v37 = vpop.f32.mrb[21].mxu0  ;;  %v674_v38 = vpop.f32.mrb[18].mxu1 }
 0x465   :  { %v722_v39 = vpop.f32.mrb[22].mxu0  ;;  %v3194_v42 = vpop.f32.mrb[19].mxu1 }
 0x466   :  { %v3200_v43 = vpop.f32.mrb[23].mxu0  ;;  %3240 = vmatmul.mubr.msk.bf16.vlgmr.msra.gmra.mrb[32].mxu1 %vm142_vm2, %v1013_v34 }
 0x467   :  { %3251 = vmatprep.mubr.msk.bf16.mxu1 %vm3575_vm0, %v3574_v0  ;;  %3250 = vmatpush3.bf16.msra.mxu1 %v1127_v35 }
 0x468   :  { %3261 = vmatprep.subr.bf16.mxu1 %v3574_v0 }
 0x4bb   :  { %v767_v40 = vpop.f32.mrb[20].mxu1 }
 0x4bc   :  { %v815_v45 = vpop.f32.mrb[24].mxu0  ;;  %v3205_v46 = vpop.f32.mrb[21].mxu1 }
 0x4bd   :  { %v1068_v47 = vpack.c.bf16 %v815_v45, %v767_v40  ;;  %v3211_v48 = vpop.f32.mrb[25].mxu0  ;;  %v770_v49 = vpop.f32.mrb[22].mxu1 }
 0x4be   :  { %v818_v51 = vpop.f32.mrb[26].mxu0  ;;  %v3206_v52 = vpop.f32.mrb[23].mxu1 }
 0x4bf   :  { %v3212_v53 = vpop.f32.mrb[27].mxu0  ;;  %3246 = vmatmul.mubr.msk.bf16.vlgmr.msra.gmra.mrb[36].mxu0 %vm142_vm2, %v1068_v47 }
 0x4c0   :  { %3256 = vmatpush3.bf16.msra.mxu0 %v1179_v50  ;;  %3257 = vmatprep.mubr.msk.bf16.mxu0 %vm3575_vm0, %v3574_v0 }
 0x4c1   :  { %3269 = vmatprep.subr.bf16.mxu0 %v3574_v0 }
 0x4c4   :  { %v911_v54 = vpop.f32.mrb[28].mxu0 }
 0x4c5   :  { %v3223_v55 = vpop.f32.mrb[29].mxu0 }
 0x4c6   :  { %v914_v56 = vpop.f32.mrb[30].mxu0  ;;  %v3479_v55 = vld [vmem:[%s4302_s5] sm:$0xff]  }
 0x4c7   :  { %v3224_v57 = vpop.f32.mrb[31].mxu0  ;;  %v3480_v56 = vld [vmem:[%s4302_s5 + $0x8] sm:$0xff]  }
 0x4ed   :  { %v1007_v58 = vpop.f32.mrb[32].mxu0 }
 0x4ee   :  { %v3235_v59 = vpop.f32.mrb[33].mxu0 }
 0x4ef   :  { %v1010_v61 = vpop.f32.mrb[34].mxu0 }
 0x4f0   :  { %v863_v63 = vpop.f32.mrb[24].mxu1  ;;  %v3236_v1 = vpop.f32.mrb[35].mxu0 }
 0x4f1   :  { %v1120_v2 = vpack.c.bf16 %v911_v54, %v863_v63  ;;  %v3217_v3 = vpop.f32.mrb[25].mxu1  ;;  %v3478_v54 = vld [vmem:[%s4301_s4 + $0x8] sm:$0xff]  }
 0x4f2   :  { %v866_v41 = vpop.f32.mrb[26].mxu1 }
 0x4f3   :  { %v3218_v4 = vpop.f32.mrb[27].mxu1  ;;  %3252 = vmatmul.mubr.msk.bf16.vlgmr.msra.gmra.mrb[36].mxu1 %vm142_vm2, %v1120_v2  ;;  %v1255_v2 = vsub.s32 2, %v3665_v10  ;;  %v1261_v41 = vsub.s32 3, %v3665_v10 }
 0x4f4   :  { %3265 = vmatprep.mubr.msk.bf16.mxu1 %vm3575_vm0, %v3574_v0 }
 0x4f5   :  { %v1256_v3 = vrot.slane %v3671_v12, %v1255_v2 }
 0x4f8   :  { %v959_v8 = vpop.f32.mrb[28].mxu1 }
 0x4f9   :  { %v1172_v27 = vpack.c.bf16 %v1007_v58, %v959_v8  ;;  %v3229_v28 = vpop.f32.mrb[29].mxu1 }
 0x4fa   :  { %v962_v13 = vpop.f32.mrb[30].mxu1 }
 0x4fb   :  { %v3230_v62 = vpop.f32.mrb[31].mxu1  ;;  %3258 = vmatmul.mubr.msk.bf16.vlgmr.msra.gmra.mrb[40].mxu0 %vm142_vm2, %v1172_v27 }
 0x4fc   :  { %3277 = vmatprep.mubr.msk.bf16.mxu0 %vm3575_vm0, %v3574_v0  ;;  %3270 = vmatpush3.bf16.msra.mxu0 %v3479_v55  ;;  %v1262_v62 = vrot.slane %v3671_v12, %v1261_v41 }
 0x4fd   :  { %3271 = vmatprep.subr.bf16.mxu0 %v3574_v0 }
 0x500   :  { %3272 = vmatpush3.bf16.msra.mxu0 %v3480_v56 }
 0x501   :  { %3273 = vmatprep.subr.bf16.mxu0 %v3574_v0 }
 0x539   :  { %v1055_v5 = vpop.f32.mrb[32].mxu1 }
 0x53a   :  { %v3241_v9 = vpop.f32.mrb[33].mxu1  ;;  %v1066_v20 = vadd.f32 %v1065_v19, %v1055_v5 }
 0x53b   :  { %v1058_v14 = vpop.f32.mrb[34].mxu1 }
 0x53c   :  { %v3242_v15 = vpop.f32.mrb[35].mxu1  ;;  %v1067_v36 = vadd.f32 %v1065_v19, %v1058_v14  ;;  %v3481_v19 = vld [vmem:[%s4302_s5 + $0x10] sm:$0xff]  }
 0x53d   :  { %3274 = vmatpush3.bf16.msra.mxu0 %v3481_v19  ;;  %v3986_v19 = vld [vmem:[%s4299_s6 + $0x8] sm:$0xff] }
 0x53e   :  { %3275 = vmatprep.subr.bf16.mxu0 %v3574_v0 }
 0x592   :  { %v1111_v21 = vpop.f32.mrb[36].mxu0 }
 0x593   :  { %v1118_v22 = vadd.f32 %v1111_v21, %v1066_v20  ;;  %v3247_v17 = vpop.f32.mrb[37].mxu0  ;;  %v3482_v20 = vld [vmem:[%s4302_s5 + $0x18] sm:$0xff]   ;;  %v1272_v21 = vsub.s32 4, %v3665_v10 }
 0x594   :  { %v1114_v18 = vpop.f32.mrb[38].mxu0  ;;  %3276 = vmatpush3.bf16.msra.mxu0 %v3482_v20  ;;  %v1465_v20 = vrot.slane %v3986_v19, %v52_v11 }
 0x595   :  { %v1119_v23 = vadd.f32 %v1114_v18, %v1067_v36  ;;  %v3248_v24 = vpop.f32.mrb[39].mxu0  ;;  %3295 = vmatprep.subr.bf16.mxu0 %v3574_v0  ;;  %v1273_v36 = vrot.slane %v3671_v12, %v1272_v21 }
 0x5c6   :  { %v1163_v25 = vpop.f32.mrb[36].mxu1 }
 0x5c7   :  { %v1170_v26 = vadd.f32 %v1163_v25, %v1118_v22  ;;  %v3253_v29 = vpop.f32.mrb[37].mxu1 }
 0x5c8   :  { %v1166_v30 = vpop.f32.mrb[38].mxu1 }
 0x5c9   :  { %v1171_v32 = vadd.f32 %v1166_v30, %v1119_v23  ;;  %v3254_v33 = vpop.f32.mrb[39].mxu1 }
 0x5ce   :  { %v1215_v34 = vpop.f32.mrb[40].mxu0 }
 0x5cf   :  { %v1222_v37 = vadd.f32 %v1215_v34, %v1170_v26  ;;  %v3259_v38 = vpop.f32.mrb[41].mxu0 }
 0x5d0   :  { %v1218_v39 = vpop.f32.mrb[42].mxu0 }
 0x5d1   :  { %v1223_v42 = vadd.f32 %v1218_v39, %v1171_v32  ;;  %v3260_v43 = vpop.f32.mrb[43].mxu0  ;;  %v1224_v44 = vadd.f32 %v1222_v37, %v3654_v6  ;;  %v1343_v32 = vsub.s32 5, %v3665_v10 }
 0x5d3   :  { %v1226_v35 = vsel %vm66_vm1, %v1224_v44, 0.0  ;;  %v1225_v31 = vadd.f32 %v1223_v42, %v3656_v7  ;;  %v3477_v7 = vld [vmem:[%s4301_s4] sm:$0xff]   ;;  %v1344_v33 = vrot.slane %v3671_v12, %v1343_v32 }
 0x5d4   :  { %1227 = vadd.xlane.f32.xlu1 %v1226_v35  ;;  %3262 = vmatpush3.bf16.msra.mxu1 %v3477_v7  ;;  %v3484_v7 = vld [vmem:[%s4296_s2 + $0x18] sm:$0xff]  }
 0x5d5   :  { %v1229_v40 = vsel %vm66_vm1, %v1225_v31, 0.0  ;;  %3263 = vmatprep.subr.bf16.mxu1 %v3574_v0 }
 0x5d6   :  { %1230 = vadd.xlane.f32.xlu0 %v1229_v40 }
 0x5d8   :  { %3264 = vmatpush3.bf16.msra.mxu1 %v3478_v54 }
 0x5d9   :  { %3281 = vmatprep.subr.bf16.mxu1 %v3574_v0 }
 0x661   :  { %v1228_v45 = vpop.xlane.xlu1 %1227 }
 0x662   :  { %v1233_v46 = vmul.f32 0.03125, %v1228_v45 }
 0x663   :  { %v1231_v47 = vpop.xlane.xlu0 %1230 }
 0x664   :  { %v1235_v48 = vsub.f32 %v1224_v44, %v1233_v46  ;;  %v1234_v49 = vmul.f32 0.03125, %v1231_v47 }
 0x666   :  { %v1236_v50 = vsub.f32 %v1225_v31, %v1234_v49  ;;  %v1237_v51 = vmul.f32 %v1235_v48, %v1235_v48 }
 0x668   :  { %v1239_v52 = vsel %vm66_vm1, %v1237_v51, 0.0  ;;  %v1238_v53 = vmul.f32 %v1236_v50, %v1236_v50 }
 0x669   :  { %1240 = vadd.xlane.f32.xlu0 %v1239_v52 }
 0x66a   :  { %v1242_v6 = vsel %vm66_vm1, %v1238_v53, 0.0 }
 0x66b   :  { %1243 = vadd.xlane.f32.xlu1 %v1242_v6  ;;  %v3483_v6 = vld [vmem:[%s4296_s2 + $0x10] sm:$0xff]  }
 0x6f6   :  { %v1241_v57 = vpop.xlane.xlu0 %1240 }
 0x6f7   :  { %v1245_v58 = vmul.f32 0.03125, %v1241_v57 }
 0x6f8   :  { %v1244_v59 = vpop.xlane.xlu1 %1243 }
 0x6f9   :  { %v1247_v61 = vadd.f32 1e-05, %v1245_v58  ;;  %v1246_v63 = vmul.f32 0.03125, %v1244_v59 }
 0x6fb   :  { %3525 = vrsqrt.f32 %v1247_v61  ;;  %v1248_v1 = vadd.f32 1e-05, %v1246_v63  ;;  %v1444_v61 = vsub.s32 6, %v3665_v10  ;;  %v3573_v63 = vld [vmem:[%s4299_s6] sm:$0xff] }
 0x6fd   :  { %3527 = vrsqrt.f32 %v1248_v1  ;;  %v1445_v1 = vrot.slane %v3573_v63, %v1444_v61 }
 0x705   :  { %v3526_v4 = vpop.eup %3525 }
 0x706   :  { %v1251_v8 = vmul.f32 %v3526_v4, %v1235_v48 }
 0x707   :  { %v3528_v27 = vpop.eup %3527 }
 0x708   :  { %v1257_v28 = vmul.f32 %v1256_v3, %v1251_v8  ;;  %v1252_v13 = vmul.f32 %v3528_v27, %v1236_v50 }
 0x70a   :  { %v1258_v5 = vmul.f32 %v1256_v3, %v1252_v13  ;;  %v1263_v9 = vadd.f32 %v1262_v62, %v1257_v28  ;;  %v1450_v3 = vsub.s32 7, %v3665_v10 }
 0x70c   :  { %v1264_v14 = vadd.f32 %v1262_v62, %v1258_v5  ;;  %v1451_v62 = vrot.slane %v3573_v63, %v1450_v3 }
 0x70e   :  { %v1265_v15 = vpack.c.bf16 %v1264_v14, %v1263_v9 }
 0x710   :  { %3266 = vmatmul.mubr.msk.bf16.vlgmr.msra.gmra.mrb[40].mxu1 %vm66_vm1, %v1265_v15 }
 0x711   :  { %3285 = vmatprep.mubr.msk.bf16.mxu1 %vm3575_vm0, %v3574_v0  ;;  %3282 = vmatpush3.bf16.msra.mxu1 %v3483_v6 }
 0x712   :  { %3283 = vmatprep.subr.bf16.mxu1 %v3574_v0 }
 0x715   :  { %3284 = vmatpush3.bf16.msra.mxu1 %v3484_v7 }
 0x716   :  { %3289 = vmatprep.subr.bf16.mxu1 %v3574_v0 }
 0x7e3   :  { %v1323_v22 = vpop.f32.mrb[40].mxu1 }
 0x7e4   :  { %v1324_v17 = vadd.f32 %v1323_v22, %v1273_v36  ;;  %v3267_v18 = vpop.f32.mrb[41].mxu1 }
 0x7e5   :  { %v1326_v23 = vpop.f32.mrb[42].mxu1 }
 0x7e6   :  { %v1327_v24 = vadd.f32 %v1326_v23, %v1273_v36  ;;  %v3268_v25 = vpop.f32.mrb[43].mxu1  ;;  %v1330_v26 = vmax.f32 %v1324_v17, 0.0 }
 0x7e8   :  { %v1331_v29 = vmax.f32 %v1327_v24, 0.0 }
 0x7ea   :  { %v1332_v30 = vpack.c.bf16 %v1331_v29, %v1330_v26 }
 0x7ec   :  { %3278 = vmatmul.mubr.msk.bf16.vlgmr.msra.gmra.mrb[44].mxu0 %vm1369_vm5, %v1332_v30 }
 0x7ed   :  { %3297 = vmatprep.mubr.msk.bf16.mxu0 %vm3575_vm0, %v3574_v0 }
 0x8bf   :  { %v1407_v34 = vpop.f32.mrb[44].mxu0 }
 0x8c0   :  { %v1408_v37 = vadd.f32 %v1407_v34, %v1344_v33  ;;  %v3279_v38 = vpop.f32.mrb[45].mxu0 }
 0x8c1   :  { %v1410_v39 = vpop.f32.mrb[46].mxu0 }
 0x8c2   :  { %v1411_v42 = vadd.f32 %v1410_v39, %v1344_v33  ;;  %v3280_v43 = vpop.f32.mrb[47].mxu0  ;;  %v1414_v44 = vadd.f32 %v1408_v37, %v1263_v9 }
 0x8c4   :  { %v1416_v35 = vsel %vm66_vm1, %v1414_v44, 0.0  ;;  %v1415_v31 = vadd.f32 %v1411_v42, %v1264_v14 }
 0x8c5   :  { %1417 = vadd.xlane.f32.xlu0 %v1416_v35 }
 0x8c6   :  { %v1419_v40 = vsel %vm66_vm1, %v1415_v31, 0.0 }
 0x8c7   :  { %1420 = vadd.xlane.f32.xlu1 %v1419_v40 }
 0x952   :  { %v1418_v45 = vpop.xlane.xlu0 %1417 }
 0x953   :  { %v1422_v46 = vmul.f32 0.03125, %v1418_v45 }
 0x954   :  { %v1421_v47 = vpop.xlane.xlu1 %1420 }
 0x955   :  { %v1424_v48 = vsub.f32 %v1414_v44, %v1422_v46  ;;  %v1423_v49 = vmul.f32 0.03125, %v1421_v47 }
 0x957   :  { %v1425_v12 = vsub.f32 %v1415_v31, %v1423_v49  ;;  %v1426_v50 = vmul.f32 %v1424_v48, %v1424_v48 }
 0x959   :  { %v1428_v51 = vsel %vm66_vm1, %v1426_v50, 0.0  ;;  %v1427_v52 = vmul.f32 %v1425_v12, %v1425_v12 }
 0x95a   :  { %1429 = vadd.xlane.f32.xlu0 %v1428_v51 }
 0x95b   :  { %v1431_v53 = vsel %vm66_vm1, %v1427_v52, 0.0 }
 0x95c   :  { %1432 = vadd.xlane.f32.xlu1 %v1431_v53 }
 0x9e7   :  { %v1430_v54 = vpop.xlane.xlu0 %1429 }
 0x9e8   :  { %v1434_v55 = vmul.f32 0.03125, %v1430_v54 }
 0x9e9   :  { %v1433_v56 = vpop.xlane.xlu1 %1432 }
 0x9ea   :  { %v1436_v57 = vadd.f32 1e-05, %v1434_v55  ;;  %v1435_v58 = vmul.f32 0.03125, %v1433_v56 }
 0x9ec   :  { %3529 = vrsqrt.f32 %v1436_v57  ;;  %v1437_v59 = vadd.f32 1e-05, %v1435_v58 }
 0x9ee   :  { %3531 = vrsqrt.f32 %v1437_v59 }
 0x9f6   :  { %v3530_v4 = vpop.eup %3529 }
 0x9f7   :  { %v1440_v8 = vmul.f32 %v3530_v4, %v1424_v48 }
 0x9f8   :  { %v3532_v27 = vpop.eup %3531 }
 0x9f9   :  { %v1446_v28 = vmul.f32 %v1445_v1, %v1440_v8  ;;  %v1441_v13 = vmul.f32 %v3532_v27, %v1425_v12 }
 0x9fb   :  { %v1447_v5 = vmul.f32 %v1445_v1, %v1441_v13  ;;  %v3974_v9 = vadd.f32 %v1451_v62, %v1446_v28 }
 0x9fd   :  { %v3976_v14 = vadd.f32 %v1451_v62, %v1447_v5 }
 0x9ff   :  { %v1456_v15 = vpack.c.bf16 %v3976_v14, %v3974_v9 }
 0xa01   :  { %3286 = vmatmul.mubr.msk.bf16.vlgmr.msra.gmra.mrb[44].mxu1 %vm66_vm1, %v1456_v15 }
 0xa02   :  { %3291 = vmatprep.mubr.msk.bf16.mxu1 %vm3575_vm0, %v3574_v0 }
 0xad4   :  { %v1515_v36 = vpop.f32.mrb[44].mxu1 }
 0xad5   :  { %v3287_v22 = vpop.f32.mrb[45].mxu1  ;;  %v1516_v18 = vadd.f32 %v1515_v36, %v1465_v20 }
 0xad6   :  { %v1518_v17 = vpop.f32.mrb[46].mxu1 }
 0xad7   :  { %v1519_v23 = vadd.f32 %v1518_v17, %v1465_v20  ;;  %v3288_v24 = vpop.f32.mrb[47].mxu1  ;;  %v1542_v26 = vpack.c.bf16 %v1516_v18, %v1516_v18 }
 0xad9   :  { %v3465_v25 = vpack.i.bf16 %v1519_v23, %v1516_v18  ;;  %v3995_v29 = vpack.c.bf16 %v1519_v23, %v1519_v23 }
 0xadb   :  { %3466 = vrot.lane.b32.xlu1 %v3465_v25, %s3579_s22  ;;  %3461 = vrot.lane.b32.xlu0 %v3465_v25, %s3577_s20 }
 0xadf   :  { %3471 = vrot.lane.b32.xlu1 %v3465_v25, %s3576_s19  ;;  %1551 = vrot.lane.b32.xlu0 %v1542_v26, %s3578_s21 }
 0xae3   :  { %1600 = vrot.lane.b32.xlu1 %v3995_v29, %s3578_s21 }
 0xb4d   :  { %v3467_v11 = vpop.permute.xlu1 %3466  ;;  %v3462_v30 = vpop.permute.xlu0 %3461 }
 0xb4e   :  { %v3464_v33 = vunpack.i.h.bf16 %v3462_v30  ;;  %v3463_v34 = vunpack.i.l.bf16 %v3462_v30  ;;  %v3469_v37 = vunpack.i.h.bf16 %v3467_v11  ;;  %v3468_v38 = vunpack.i.l.bf16 %v3467_v11 }
 0xb50   :  { %v3999_v39 = vpack.c.bf16 %v3464_v33, %v3464_v33  ;;  %v4001_v42 = vpack.c.bf16 %v3463_v34, %v3463_v34  ;;  %v4008_v31 = vpack.c.bf16 %v3469_v37, %v3469_v37  ;;  %v4010_v40 = vpack.c.bf16 %v3468_v38, %v3468_v38 }
 0xb51   :  { %v3472_v43 = vpop.permute.xlu1 %3471  ;;  %v1552_v44 = vpop.permute.xlu0 %1551 }
 0xb52   :  { %v1557_v35 = vsel %vm142_vm2, %v1552_v44, 0  ;;  %1649 = vrot.lane.b32.xlu0 %v4001_v42, %s3578_s21  ;;  %1698 = vrot.lane.b32.xlu1 %v3999_v39, %s3578_s21  ;;  %v3473_v45 = vunpack.i.l.bf16 %v3472_v43  ;;  %v3474_v46 = vunpack.i.h.bf16 %v3472_v43 }
 0xb53   :  { %3290 = vmatpush3.bf16.xpose.msra.mxu1 %v1557_v35 }
 0xb54   :  { %3301 = vmatprep.subr.bf16.mxu1 %v3574_v0  ;;  %v4018_v49 = vpack.c.bf16 %v3473_v45, %v3473_v45  ;;  %v4021_v12 = vpack.c.bf16 %v3474_v46, %v3474_v46 }
 0xb55   :  { %v1601_v47 = vpop.permute.xlu1 %1600 }
 0xb56   :  { %v1606_v48 = vsel %vm142_vm2, %v1601_v47, 0  ;;  %1747 = vrot.lane.b32.xlu0 %v4010_v40, %s3578_s21  ;;  %1796 = vrot.lane.b32.xlu1 %v4008_v31, %s3578_s21 }
 0xb57   :  { %3296 = vmatpush3.bf16.xpose.msra.mxu0 %v1606_v48 }
 0xb58   :  { %3307 = vmatprep.subr.bf16.mxu0 %v3574_v0 }
 0xb5a   :  { %3292 = vmatmul.mubr.msk.bf16.vlgmr.msra.gmra.mrb[48].mxu1 %vm142_vm2, %v1542_v26  ;;  %1845 = vrot.lane.b32.xlu0 %v4018_v49, %s3578_s21 }
 0xb5b   :  { %1894 = vrot.lane.b32.xlu1 %v4021_v12, %s3578_s21  ;;  %3303 = vmatprep.mubr.msk.bf16.mxu1 %vm3575_vm0, %v3574_v0 }
 0xb5e   :  { %3298 = vmatmul.mubr.msk.bf16.vlgmr.msra.gmra.mrb[48].mxu0 %vm142_vm2, %v3995_v29 }
 0xb5f   :  { %2038 = vrot.lane.b32.xlu1 %v1542_v26, %s3580_s23  ;;  %3309 = vmatprep.mubr.msk.bf16.mxu0 %vm3575_vm0, %v3574_v0 }
 0xbc4   :  { %v1650_v50 = vpop.permute.xlu0 %1649  ;;  %v1699_v51 = vpop.permute.xlu1 %1698 }
 0xbc5   :  { %v1655_v52 = vsel %vm142_vm2, %v1650_v50, 0  ;;  %v1704_v53 = vsel %vm142_vm2, %v1699_v51, 0 }
 0xbc6   :  { %3302 = vmatpush3.bf16.xpose.msra.mxu1 %v1655_v52  ;;  %3308 = vmatpush3.bf16.xpose.msra.mxu0 %v1704_v53 }
 0xbc7   :  { %3313 = vmatprep.subr.bf16.mxu1 %v3574_v0  ;;  %3319 = vmatprep.subr.bf16.mxu0 %v3574_v0 }
 0xbc8   :  { %v1748_v6 = vpop.permute.xlu0 %1747  ;;  %v1797_v7 = vpop.permute.xlu1 %1796 }
 0xbc9   :  { %v1753_v54 = vsel %vm142_vm2, %v1748_v6, 0  ;;  %v1802_v55 = vsel %vm142_vm2, %v1797_v7, 0 }
 0xbcc   :  { %v1846_v56 = vpop.permute.xlu0 %1845 }
 0xbcd   :  { %3304 = vmatmul.mubr.msk.bf16.vlgmr.msra.gmra.mrb[52].mxu1 %vm142_vm2, %v4001_v42  ;;  %3310 = vmatmul.mubr.msk.bf16.vlgmr.msra.gmra.mrb[52].mxu0 %vm142_vm2, %v3999_v39  ;;  %v1895_v57 = vpop.permute.xlu1 %1894  ;;  %v1851_v58 = vsel %vm142_vm2, %v1846_v56, 0 }
 0xbce   :  { %3314 = vmatpush3.bf16.xpose.msra.mxu1 %v1753_v54  ;;  %3320 = vmatpush3.bf16.xpose.msra.mxu0 %v1802_v55  ;;  %v1900_v59 = vsel %vm142_vm2, %v1895_v57, 0 }
 0xbcf   :  { %3315 = vmatprep.mubr.msk.bf16.mxu1 %vm3575_vm0, %v3574_v0  ;;  %3321 = vmatprep.mubr.msk.bf16.mxu0 %vm3575_vm0, %v3574_v0 }
 0xbd0   :  { %3325 = vmatprep.subr.bf16.mxu1 %v3574_v0  ;;  %3331 = vmatprep.subr.bf16.mxu0 %v3574_v0 }
 0xbd1   :  { %v2039_v63 = vpop.permute.xlu1 %2038 }
 0xbd2   :  { %v2044_v1 = vsel %vm633_vm3, %v2039_v63, 0 }
 0xbd5   :  { %3316 = vmatmul.mubr.msk.bf16.vlgmr.msra.gmra.mrb[56].mxu1 %vm142_vm2, %v4010_v40  ;;  %3322 = vmatmul.mubr.msk.bf16.vlgmr.msra.gmra.mrb[56].mxu0 %vm142_vm2, %v4008_v31 }
 0xbd6   :  { %3326 = vmatpush3.bf16.xpose.msra.mxu1 %v1851_v58  ;;  %3332 = vmatpush3.bf16.xpose.msra.mxu0 %v1900_v59 }
 0xbd7   :  { %3327 = vmatprep.mubr.msk.bf16.mxu1 %vm3575_vm0, %v3574_v0  ;;  %3333 = vmatprep.mubr.msk.bf16.mxu0 %vm3575_vm0, %v3574_v0 }
 0xbd8   :  { %3337 = vmatprep.subr.bf16.mxu1 %v3574_v0  ;;  %3343 = vmatprep.subr.bf16.mxu0 %v3574_v0 }
 0xbdd   :  { %3328 = vmatmul.mubr.msk.bf16.vlgmr.msra.gmra.mrb[60].mxu1 %vm142_vm2, %v4018_v49  ;;  %3334 = vmatmul.mubr.msk.bf16.vlgmr.msra.gmra.mrb[60].mxu0 %vm142_vm2, %v4021_v12 }
 0xbde   :  { %3338 = vmatpush3.bf16.msra.mxu1 %v2044_v1  ;;  %3345 = vmatprep.mubr.msk.bf16.mxu0 %vm3575_vm0, %v3574_v0 }
 0xbdf   :  { %3339 = vmatprep.mubr.msk.bf16.mxu1 %vm3575_vm0, %v3574_v0  ;;  %3349 = vmatprep.subr.bf16.mxu1 %v3574_v0 }
 0xc2d   :  { %v1593_v4 = vpop.f32.mrb[48].mxu1 }
 0xc2e   :  { %v4074_v8 = vadd.f32 %v1593_v4, %v3759_v60  ;;  %v3293_v27 = vpop.f32.mrb[49].mxu1 }
 0xc2f   :  { %v1596_v28 = vpop.f32.mrb[50].mxu1 }
 0xc30   :  { %v3294_v13 = vpop.f32.mrb[51].mxu1  ;;  %v1942_v62 = vsel %vm142_vm2, %v4074_v8, -inf }
 0xc31   :  { %1943 = vmax.xlane.f32.xlu0 %v1942_v62  ;;  %v1642_v5 = vpop.f32.mrb[48].mxu0 }
 0xc32   :  { %v1643_v15 = vadd.f32 %v1642_v5, %v3759_v60  ;;  %v3299_v20 = vpop.f32.mrb[49].mxu0 }
 0xc33   :  { %v1645_v36 = vpop.f32.mrb[50].mxu0 }
 0xc34   :  { %v3300_v22 = vpop.f32.mrb[51].mxu0  ;;  %v1945_v17 = vsel %vm142_vm2, %v1643_v15, -inf }
 0xc35   :  { %1946 = vmax.xlane.f32.xlu1 %v1945_v17 }
 0xca0   :  { %v1691_v18 = vpop.f32.mrb[52].mxu1  ;;  %v1740_v23 = vpop.f32.mrb[52].mxu0 }
 0xca1   :  { %v1692_v24 = vadd.f32 %v1691_v18, %v3759_v60  ;;  %v3305_v25 = vpop.f32.mrb[53].mxu1  ;;  %v3311_v26 = vpop.f32.mrb[53].mxu0  ;;  %v1741_v33 = vadd.f32 %v1740_v23, %v3759_v60 }
 0xca2   :  { %v1694_v11 = vpop.f32.mrb[54].mxu1  ;;  %v1743_v30 = vpop.f32.mrb[54].mxu0 }
 0xca3   :  { %v3306_v34 = vpop.f32.mrb[55].mxu1  ;;  %v3312_v37 = vpop.f32.mrb[55].mxu0  ;;  %v1948_v38 = vsel %vm142_vm2, %v1692_v24, -inf  ;;  %v1951_v43 = vsel %vm142_vm2, %v1741_v33, -inf }
 0xca4   :  { %1949 = vmax.xlane.f32.xlu0 %v1948_v38 }
 0xca8   :  { %v1789_v44 = vpop.f32.mrb[56].mxu1  ;;  %1952 = vmax.xlane.f32.xlu0 %v1951_v43  ;;  %v1838_v35 = vpop.f32.mrb[56].mxu0 }
 0xca9   :  { %v4085_v45 = vadd.f32 %v1789_v44, %v3759_v60  ;;  %v4088_v46 = vadd.f32 %v1838_v35, %v3759_v60  ;;  %v3317_v47 = vpop.f32.mrb[57].mxu1  ;;  %v3323_v48 = vpop.f32.mrb[57].mxu0 }
 0xcaa   :  { %v1792_v50 = vpop.f32.mrb[58].mxu1  ;;  %v1841_v51 = vpop.f32.mrb[58].mxu0 }
 0xcab   :  { %v3318_v52 = vpop.f32.mrb[59].mxu1  ;;  %v3324_v53 = vpop.f32.mrb[59].mxu0  ;;  %v1954_v6 = vsel %vm142_vm2, %v4085_v45, -inf  ;;  %v1957_v7 = vsel %vm142_vm2, %v4088_v46, -inf }
 0xcac   :  { %1955 = vmax.xlane.f32.xlu1 %v1954_v6  ;;  %1958 = vmax.xlane.f32.xlu0 %v1957_v7 }
 0xcb0   :  { %v1887_v54 = vpop.f32.mrb[60].mxu1  ;;  %v1936_v55 = vpop.f32.mrb[60].mxu0 }
 0xcb1   :  { %v1888_v56 = vadd.f32 %v1887_v54, %v3759_v60  ;;  %v1937_v57 = vadd.f32 %v1936_v55, %v3759_v60  ;;  %v3329_v58 = vpop.f32.mrb[61].mxu1  ;;  %v3335_v59 = vpop.f32.mrb[61].mxu0 }
 0xcb2   :  { %v1890_v63 = vpop.f32.mrb[62].mxu1  ;;  %v1939_v1 = vpop.f32.mrb[62].mxu0 }
 0xcb3   :  { %v3330_v4 = vpop.f32.mrb[63].mxu1  ;;  %v3336_v27 = vpop.f32.mrb[63].mxu0  ;;  %v1960_v28 = vsel %vm142_vm2, %v1888_v56, -inf  ;;  %v1963_v13 = vsel %vm142_vm2, %v1937_v57, -inf }
 0xcb4   :  { %1961 = vmax.xlane.f32.xlu1 %v1960_v28  ;;  %1964 = vmax.xlane.f32.xlu0 %v1963_v13 }
 0xcbe   :  { %v1944_v5 = vpop.xlane.xlu0 %1943 }
 0xcbf   :  { %v1966_v20 = vsub.f32 %v4074_v8, %v1944_v5 }
 0xcc1   :  { %v1974_v22 = vmul.f32 1.442695, %v1966_v20 }
 0xcc2   :  { %v1947_v60 = vpop.xlane.xlu1 %1946 }
 0xcc3   :  { %v1967_v62 = vsub.f32 %v1643_v15, %v1947_v60 }
 0xcc5   :  { %2134 = vrot.lane.b32.xlu1 %v4001_v42, %s3580_s23  ;;  %v1976_v36 = vmul.f32 1.442695, %v1967_v62 }
 0xcc7   :  { %3533 = vpow2.f32 %v1976_v36 }
 0xcc8   :  { %3535 = vpow2.f32 %v1974_v22 }
 0xcc9   :  { %2182 = vrot.lane.b32.xlu1 %v3999_v39, %s3580_s23 }
 0xcca   :  { %2086 = vrot.lane.b32.xlu0 %v3995_v29, %s3580_s23 }
 0xcd1   :  { %v3534_v17 = vpop.eup %3533 }
 0xcd2   :  { %v1993_v18 = vsel %vm142_vm2, %v3534_v17, 0.0  ;;  %v4106_v23 = vpop.eup %3535 }
 0xcd3   :  { %v1990_v39 = vsel %vm142_vm2, %v4106_v23, 0.0 }
 0xce9   :  { %1994 = vadd.xlane.f32.xlu0 %v1993_v18 }
 0xced   :  { %1991 = vadd.xlane.f32.xlu1 %v1990_v39 }
 0xd31   :  { %v1950_v29 = vpop.xlane.xlu0 %1949 }
 0xd32   :  { %v1968_v42 = vsub.f32 %v1692_v24, %v1950_v29 }
 0xd34   :  { %v1978_v15 = vmul.f32 1.442695, %v1968_v42 }
 0xd35   :  { %v1953_v25 = vpop.xlane.xlu0 %1952 }
 0xd36   :  { %3537 = vpow2.f32 %v1978_v15  ;;  %v1969_v8 = vsub.f32 %v1741_v33, %v1953_v25 }
 0xd38   :  { %v1980_v26 = vmul.f32 1.442695, %v1969_v8 }
 0xd39   :  { %v1959_v11 = vpop.xlane.xlu0 %1958  ;;  %v1956_v33 = vpop.xlane.xlu1 %1955 }
 0xd3a   :  { %3539 = vpow2.f32 %v1980_v26  ;;  %v1970_v35 = vsub.f32 %v4085_v45, %v1956_v33  ;;  %v1971_v48 = vsub.f32 %v4088_v46, %v1959_v11 }
 0xd3c   :  { %v1982_v50 = vmul.f32 1.442695, %v1970_v35  ;;  %v1984_v52 = vmul.f32 1.442695, %v1971_v48 }
 0xd3e   :  { %3541 = vpow2.f32 %v1982_v50 }
 0xd3f   :  { %3543 = vpow2.f32 %v1984_v52 }
 0xd40   :  { %v4110_v30 = vpop.eup %3537 }
 0xd41   :  { %v1965_v34 = vpop.xlane.xlu0 %1964  ;;  %v1996_v37 = vsel %vm142_vm2, %v4110_v30, 0.0  ;;  %v1962_v47 = vpop.xlane.xlu1 %1961 }
 0xd42   :  { %1997 = vadd.xlane.f32.xlu1 %v1996_v37  ;;  %v1972_v51 = vsub.f32 %v1888_v56, %v1962_v47  ;;  %v1973_v6 = vsub.f32 %v1937_v57, %v1965_v34 }
 0xd44   :  { %v4114_v38 = vpop.eup %3539  ;;  %v1986_v53 = vmul.f32 1.442695, %v1972_v51  ;;  %v1988_v7 = vmul.f32 1.442695, %v1973_v6  ;;  %v2996_v51 = vld [vmem:[%s4300_s3 + $0x10] sm:$0xf] }
 0xd45   :  { %v2087_v43 = vpop.permute.xlu0 %2086  ;;  %v1999_v24 = vsel %vm142_vm2, %v4114_v38, 0.0  ;;  %v2135_v54 = vpop.permute.xlu1 %2134 }
 0xd46   :  { %v2092_v44 = vsel %vm633_vm3, %v2087_v43, 0  ;;  %2000 = vadd.xlane.f32.xlu0 %v1999_v24  ;;  %3545 = vpow2.f32 %v1986_v53  ;;  %v2140_v20 = vsel %vm633_vm3, %v2135_v54, 0 }
 0xd47   :  { %3344 = vmatpush3.bf16.msra.mxu0 %v2092_v44  ;;  %3547 = vpow2.f32 %v1988_v7  ;;  %v2429_v7 = vsel %vm633_vm3, %v2996_v51, 0 }
 0xd48   :  { %3355 = vmatprep.subr.bf16.mxu0 %v3574_v0 }
 0xd49   :  { %v2183_v55 = vpop.permute.xlu1 %2182 }
 0xd4a   :  { %v2188_v60 = vsel %vm633_vm3, %v2183_v55, 0 }
 0xd53   :  { %2278 = vrot.lane.b32.xlu1 %v4008_v31, %s3580_s23  ;;  %v4126_v31 = vpop.eup %3541 }
 0xd54   :  { %v2002_v46 = vsel %vm142_vm2, %v4126_v31, 0.0 }
 0xd5c   :  { %2230 = vrot.lane.b32.xlu0 %v4010_v40, %s3580_s23  ;;  %v4128_v40 = vpop.eup %3543 }
 0xd5d   :  { %v4132_v58 = vpop.eup %3545  ;;  %v2005_v59 = vsel %vm142_vm2, %v4128_v40, 0.0 }
 0xd5e   :  { %v2008_v57 = vsel %vm142_vm2, %v4132_v58, 0.0  ;;  %v4138_v63 = vpop.eup %3547 }
 0xd5f   :  { %v2011_v1 = vsel %vm142_vm2, %v4138_v63, 0.0 }
 0xd76   :  { %v1995_v45 = vpop.xlane.xlu0 %1994 }
 0xd77   :  { %3549 = vrcp.f32 %v1995_v45  ;;  %2003 = vadd.xlane.f32.xlu1 %v2002_v46 }
 0xd7a   :  { %v1992_v56 = vpop.xlane.xlu1 %1991 }
 0xd7b   :  { %3551 = vrcp.f32 %v1992_v56  ;;  %2009 = vadd.xlane.f32.xlu1 %v2008_v57  ;;  %2006 = vadd.xlane.f32.xlu0 %v2005_v59 }
 0xd7f   :  { %2012 = vadd.xlane.f32.xlu0 %v2011_v1 }
 0xd81   :  { %v3550_v4 = vpop.eup %3549 }
 0xd82   :  { %v2023_v27 = vmul.f32 %v3550_v4, %v3534_v17 }
 0xd84   :  { %v2031_v28 = vpack.c.bf16 %v2023_v27, %v2023_v27  ;;  %v3000_v27 = vld [vmem:[%s4300_s3 + $0x18] sm:$0xf] }
 0xd85   :  { %v3552_v13 = vpop.eup %3551 }
 0xd86   :  { %v2022_v62 = vmul.f32 %v3552_v13, %v4106_v23  ;;  %3346 = vmatmul.mubr.msk.bf16.vlgmr.msra.gmra.mrb[64].mxu0 %vm142_vm2, %v2031_v28  ;;  %v2537_v28 = vsel %vm633_vm3, %v3000_v27, 0 }
 0xd87   :  { %3356 = vmatpush3.bf16.msra.mxu0 %v2188_v60  ;;  %3357 = vmatprep.mubr.msk.bf16.mxu0 %vm3575_vm0, %v3574_v0 }
 0xd88   :  { %v2030_v5 = vpack.c.bf16 %v2022_v62, %v2022_v62  ;;  %3367 = vmatprep.subr.bf16.mxu0 %v3574_v0 }
 0xd8a   :  { %3340 = vmatmul.mubr.msk.bf16.vlgmr.msra.gmra.mrb[64].mxu1 %vm142_vm2, %v2030_v5  ;;  %v3002_v5 = vld [vmem:[%s4300_s3 + $0x1c] sm:$0xf] }
 0xd8b   :  { %3350 = vmatpush3.bf16.msra.mxu1 %v2140_v20  ;;  %3351 = vmatprep.mubr.msk.bf16.mxu1 %vm3575_vm0, %v3574_v0 }
 0xd8c   :  { %2374 = vrot.lane.b32.xlu1 %v4021_v12, %s3580_s23  ;;  %3361 = vmatprep.subr.bf16.mxu1 %v3574_v0 }
 0xd95   :  { %2326 = vrot.lane.b32.xlu0 %v4018_v49, %s3580_s23 }
 0xdcf   :  { %v1998_v36 = vpop.xlane.xlu1 %1997 }
 0xdd0   :  { %3553 = vrcp.f32 %v1998_v36 }
 0xdd3   :  { %v2001_v22 = vpop.xlane.xlu0 %2000  ;;  %v2279_v12 = vpop.permute.xlu1 %2278 }
 0xdd4   :  { %3555 = vrcp.f32 %v2001_v22  ;;  %v2284_v25 = vsel %vm633_vm3, %v2279_v12, 0 }
 0xdd7   :  { %v2231_v23 = vpop.permute.xlu0 %2230 }
 0xdd8   :  { %v2236_v15 = vsel %vm633_vm3, %v2231_v23, 0 }
 0xdda   :  { %v3554_v17 = vpop.eup %3553 }
 0xddb   :  { %v2024_v18 = vmul.f32 %v3554_v17, %v4110_v30 }
 0xddd   :  { %v2032_v39 = vpack.c.bf16 %v2024_v18, %v2024_v18  ;;  %v2589_v18 = vsel %vm633_vm3, %v3002_v5, 0 }
 0xdde   :  { %v3556_v29 = vpop.eup %3555 }
 0xddf   :  { %v2025_v42 = vmul.f32 %v3556_v29, %v4114_v38  ;;  %3352 = vmatmul.mubr.msk.bf16.vlgmr.msra.gmra.mrb[68].mxu1 %vm142_vm2, %v2032_v39 }
 0xde0   :  { %3362 = vmatpush3.bf16.msra.mxu1 %v2236_v15  ;;  %3363 = vmatprep.mubr.msk.bf16.mxu1 %vm3575_vm0, %v3574_v0 }
 0xde1   :  { %v2033_v49 = vpack.c.bf16 %v2025_v42, %v2025_v42  ;;  %3373 = vmatprep.subr.bf16.mxu1 %v3574_v0 }
 0xde3   :  { %3358 = vmatmul.mubr.msk.bf16.vlgmr.msra.gmra.mrb[68].mxu0 %vm142_vm2, %v2033_v49 }
 0xde4   :  { %3368 = vmatpush3.bf16.msra.mxu0 %v2284_v25  ;;  %3369 = vmatprep.mubr.msk.bf16.mxu0 %vm3575_vm0, %v3574_v0 }
 0xde5   :  { %3379 = vmatprep.subr.bf16.mxu0 %v3574_v0 }
 0xe04   :  { %v2004_v8 = vpop.xlane.xlu1 %2003 }
 0xe05   :  { %3557 = vrcp.f32 %v2004_v8 }
 0xe08   :  { %v2010_v26 = vpop.xlane.xlu1 %2009  ;;  %v2007_v11 = vpop.xlane.xlu0 %2006 }
 0xe09   :  { %3559 = vrcp.f32 %v2010_v26 }
 0xe0a   :  { %3561 = vrcp.f32 %v2007_v11 }
 0xe0c   :  { %v2013_v30 = vpop.xlane.xlu0 %2012  ;;  %v2375_v48 = vpop.permute.xlu1 %2374 }
 0xe0d   :  { %3563 = vrcp.f32 %v2013_v30  ;;  %v2380_v53 = vsel %vm633_vm3, %v2375_v48, 0 }
 0xe0f   :  { %v3558_v34 = vpop.eup %3557 }
 0xe10   :  { %v2026_v37 = vmul.f32 %v3558_v34, %v4126_v31  ;;  %v2327_v38 = vpop.permute.xlu0 %2326 }
 0xe11   :  { %v2332_v33 = vsel %vm633_vm3, %v2327_v38, 0 }
 0xe12   :  { %v2034_v43 = vpack.c.bf16 %v2026_v37, %v2026_v37 }
 0xe13   :  { %v3560_v24 = vpop.eup %3559 }
 0xe14   :  { %v3562_v44 = vpop.eup %3561  ;;  %3364 = vmatmul.mubr.msk.bf16.vlgmr.msra.gmra.mrb[72].mxu1 %vm142_vm2, %v2034_v43  ;;  %v2028_v47 = vmul.f32 %v3560_v24, %v4132_v58 }
 0xe15   :  { %v2027_v35 = vmul.f32 %v3562_v44, %v4128_v40  ;;  %3374 = vmatpush3.bf16.msra.mxu1 %v2332_v33  ;;  %3375 = vmatprep.mubr.msk.bf16.mxu1 %vm3575_vm0, %v3574_v0  ;;  %v2998_v40 = vld [vmem:[%s4300_s3 + $0x14] sm:$0xf] }
 0xe16   :  { %3385 = vmatprep.subr.bf16.mxu1 %v3574_v0  ;;  %v2036_v6 = vpack.c.bf16 %v2028_v47, %v2028_v47  ;;  %v2485_v55 = vsel %vm633_vm3, %v2998_v40, 0 }
 0xe17   :  { %v2035_v50 = vpack.c.bf16 %v2027_v35, %v2027_v35  ;;  %v3564_v52 = vpop.eup %3563 }
 0xe18   :  { %v2029_v54 = vmul.f32 %v3564_v52, %v4138_v63  ;;  %v2475_v52 = vrot.slane %v3986_v19, %v1064_v16 }
 0xe19   :  { %3370 = vmatmul.mubr.msk.bf16.vlgmr.msra.gmra.mrb[72].mxu0 %vm142_vm2, %v2035_v50 }
 0xe1a   :  { %3380 = vmatpush3.bf16.msra.mxu0 %v2380_v53  ;;  %3381 = vmatprep.mubr.msk.bf16.mxu0 %vm3575_vm0, %v3574_v0  ;;  %v2037_v31 = vpack.c.bf16 %v2029_v54, %v2029_v54 }
 0xe1b   :  { %3391 = vmatprep.subr.bf16.mxu0 %v3574_v0 }
 0xe1c   :  { %3376 = vmatmul.mubr.msk.bf16.vlgmr.msra.gmra.mrb[76].mxu1 %vm142_vm2, %v2036_v6 }
 0xe1d   :  { %3386 = vmatpush3.bf16.msra.mxu1 %v2429_v7  ;;  %3387 = vmatprep.mubr.msk.bf16.mxu1 %vm3575_vm0, %v3574_v0 }
 0xe1e   :  { %3397 = vmatprep.subr.bf16.mxu1 %v3574_v0 }
 0xe21   :  { %3382 = vmatmul.mubr.msk.bf16.vlgmr.msra.gmra.mrb[76].mxu0 %vm142_vm2, %v2037_v31 }
 0xe22   :  { %3393 = vmatprep.mubr.msk.bf16.mxu0 %vm3575_vm0, %v3574_v0  ;;  %3392 = vmatpush3.bf16.msra.mxu0 %v2485_v55 }
 0xe23   :  { %3403 = vmatprep.subr.bf16.mxu0 %v3574_v0 }
 0xe59   :  { %v2128_v45 = vpop.f32.mrb[64].mxu0 }
 0xe5a   :  { %v3347_v46 = vpop.f32.mrb[65].mxu0 }
 0xe5b   :  { %v2131_v58 = vpop.f32.mrb[66].mxu0 }
 0xe5c   :  { %v3348_v56 = vpop.f32.mrb[67].mxu0 }
 0xe5d   :  { %v2080_v57 = vpop.f32.mrb[64].mxu1 }
 0xe5e   :  { %v2422_v59 = vpack.c.bf16 %v2128_v45, %v2080_v57  ;;  %v3341_v63 = vpop.f32.mrb[65].mxu1 }
 0xe5f   :  { %v2083_v1 = vpop.f32.mrb[66].mxu1 }
 0xe60   :  { %v3342_v4 = vpop.f32.mrb[67].mxu1  ;;  %3388 = vmatmul.mubr.msk.bf16.vlgmr.msra.gmra.mrb[80].mxu1 %vm142_vm2, %v2422_v59 }
 0xe61   :  { %3399 = vmatprep.mubr.msk.bf16.mxu1 %vm3575_vm0, %v3574_v0  ;;  %3398 = vmatpush3.bf16.msra.mxu1 %v2537_v28 }
 0xe62   :  { %3409 = vmatprep.subr.bf16.mxu1 %v3574_v0 }
 0xeb2   :  { %v2176_v13 = vpop.f32.mrb[68].mxu1 }
 0xeb3   :  { %v3353_v60 = vpop.f32.mrb[69].mxu1 }
 0xeb4   :  { %v2179_v62 = vpop.f32.mrb[70].mxu1 }
 0xeb5   :  { %v3354_v20 = vpop.f32.mrb[71].mxu1 }
 0xeb6   :  { %v2224_v36 = vpop.f32.mrb[68].mxu0 }
 0xeb7   :  { %v2478_v22 = vpack.c.bf16 %v2224_v36, %v2176_v13  ;;  %v3359_v17 = vpop.f32.mrb[69].mxu0 }
 0xeb8   :  { %v2227_v23 = vpop.f32.mrb[70].mxu0 }
 0xeb9   :  { %v3360_v39 = vpop.f32.mrb[71].mxu0  ;;  %3394 = vmatmul.mubr.msk.bf16.vlgmr.msra.gmra.mrb[80].mxu0 %vm142_vm2, %v2478_v22 }
 0xeba   :  { %3404 = vmatpush3.bf16.msra.mxu0 %v2589_v18  ;;  %3405 = vmatprep.mubr.msk.bf16.mxu0 %vm3575_vm0, %v3574_v0 }
 0xebb   :  { %3417 = vmatprep.subr.bf16.mxu0 %v3574_v0 }
 0xee7   :  { %v2272_v29 = vpop.f32.mrb[72].mxu1 }
 0xee8   :  { %v3365_v42 = vpop.f32.mrb[73].mxu1 }
 0xee9   :  { %v2275_v15 = vpop.f32.mrb[74].mxu1 }
 0xeea   :  { %v3366_v12 = vpop.f32.mrb[75].mxu1 }
 0xeeb   :  { %v3486_v12 = vld [vmem:[%s4301_s4 + $0x18] sm:$0xff]  }
 0xeec   :  { %v2320_v49 = vpop.f32.mrb[72].mxu0 }
 0xeed   :  { %v2530_v25 = vpack.c.bf16 %v2320_v49, %v2272_v29  ;;  %v3371_v8 = vpop.f32.mrb[73].mxu0  ;;  %v3487_v49 = vld [vmem:[%s4302_s5 + $0x20] sm:$0xff]  }
 0xeee   :  { %v2323_v26 = vpop.f32.mrb[74].mxu0 }
 0xeef   :  { %v3372_v11 = vpop.f32.mrb[75].mxu0  ;;  %3400 = vmatmul.mubr.msk.bf16.vlgmr.msra.gmra.mrb[84].mxu1 %vm142_vm2, %v2530_v25  ;;  %v2368_v30 = vpop.f32.mrb[76].mxu1  ;;  %v3488_v25 = vld [vmem:[%s4302_s5 + $0x28] sm:$0xff]  }
 0xef0   :  { %v3377_v34 = vpop.f32.mrb[77].mxu1  ;;  %3413 = vmatprep.mubr.msk.bf16.mxu1 %vm3575_vm0, %v3574_v0 }
 0xef1   :  { %v2371_v37 = vpop.f32.mrb[78].mxu1 }
 0xef2   :  { %v3378_v38 = vpop.f32.mrb[79].mxu1 }
 0xef4   :  { %v2416_v43 = vpop.f32.mrb[76].mxu0 }
 0xef5   :  { %v2582_v24 = vpack.c.bf16 %v2416_v43, %v2368_v30  ;;  %v3383_v44 = vpop.f32.mrb[77].mxu0  ;;  %v2665_v43 = vrot.slane %v3986_v19, %v1255_v2  ;;  %v3489_v2 = vld [vmem:[%s4302_s5 + $0x30] sm:$0xff]  }
 0xef6   :  { %v2419_v33 = vpop.f32.mrb[78].mxu0 }
 0xef7   :  { %v3384_v35 = vpop.f32.mrb[79].mxu0  ;;  %3406 = vmatmul.mubr.msk.bf16.vlgmr.msra.gmra.mrb[84].mxu0 %vm142_vm2, %v2582_v24 }
 0xef8   :  { %3425 = vmatprep.mubr.msk.bf16.mxu0 %vm3575_vm0, %v3574_v0  ;;  %3418 = vmatpush3.bf16.msra.mxu0 %v3487_v49 }
 0xef9   :  { %3419 = vmatprep.subr.bf16.mxu0 %v3574_v0 }
 0xefc   :  { %3420 = vmatpush3.bf16.msra.mxu0 %v3488_v25  ;;  %v2855_v25 = vrot.slane %v3986_v19, %v1444_v61 }
 0xefd   :  { %3421 = vmatprep.subr.bf16.mxu0 %v3574_v0 }
 0xf00   :  { %3422 = vmatpush3.bf16.msra.mxu0 %v3489_v2 }
 0xf01   :  { %3423 = vmatprep.subr.bf16.mxu0 %v3574_v0 }
 0xf33   :  { %v2465_v47 = vpop.f32.mrb[80].mxu1 }
 0xf34   :  { %v3389_v48 = vpop.f32.mrb[81].mxu1  ;;  %v2476_v53 = vadd.f32 %v2475_v52, %v2465_v47  ;;  %v2671_v47 = vrot.slane %v3986_v19, %v1261_v41  ;;  %v3490_v41 = vld [vmem:[%s4302_s5 + $0x38] sm:$0xff]  }
 0xf35   :  { %v2468_v50 = vpop.f32.mrb[82].mxu1  ;;  %3424 = vmatpush3.bf16.msra.mxu0 %v3490_v41 }
 0xf36   :  { %v3390_v51 = vpop.f32.mrb[83].mxu1  ;;  %v2477_v7 = vadd.f32 %v2475_v52, %v2468_v50 }
 0xf8c   :  { %v2521_v6 = vpop.f32.mrb[80].mxu0 }
 0xf8d   :  { %v2528_v54 = vadd.f32 %v2521_v6, %v2476_v53  ;;  %v3395_v31 = vpop.f32.mrb[81].mxu0  ;;  %v2683_v53 = vrot.slane %v3986_v19, %v1272_v21 }
 0xf8e   :  { %v2524_v40 = vpop.f32.mrb[82].mxu0 }
 0xf8f   :  { %v2529_v55 = vadd.f32 %v2524_v40, %v2477_v7  ;;  %v3396_v45 = vpop.f32.mrb[83].mxu0 }
 0xfc2   :  { %v2573_v46 = vpop.f32.mrb[84].mxu1 }
 0xfc3   :  { %v2580_v58 = vadd.f32 %v2573_v46, %v2528_v54  ;;  %v3401_v56 = vpop.f32.mrb[85].mxu1 }
 0xfc4   :  { %v2576_v57 = vpop.f32.mrb[86].mxu1  ;;  %v2755_v56 = vrot.slane %v3986_v19, %v1343_v32 }
 0xfc5   :  { %v2581_v59 = vadd.f32 %v2576_v57, %v2529_v55  ;;  %v3402_v63 = vpop.f32.mrb[87].mxu1 }
 0xfca   :  { %v2625_v1 = vpop.f32.mrb[84].mxu0 }
 0xfcb   :  { %v2632_v4 = vadd.f32 %v2625_v1, %v2580_v58  ;;  %v3407_v27 = vpop.f32.mrb[85].mxu0 }
 0xfcc   :  { %v2628_v28 = vpop.f32.mrb[86].mxu0 }
 0xfcd   :  { %v2633_v13 = vadd.f32 %v2628_v28, %v2581_v59  ;;  %v3408_v16 = vpop.f32.mrb[87].mxu0  ;;  %v2634_v60 = vadd.f32 %v2632_v4, %v3974_v9 }
 0xfcf   :  { %v2636_v62 = vsel %vm66_vm1, %v2634_v60, 0.0  ;;  %v2635_v5 = vadd.f32 %v2633_v13, %v3976_v14  ;;  %v3485_v14 = vld [vmem:[%s4301_s4 + $0x10] sm:$0xff]  }
 0xfd0   :  { %2637 = vadd.xlane.f32.xlu0 %v2636_v62  ;;  %3410 = vmatpush3.bf16.msra.mxu1 %v3485_v14 }
 0xfd1   :  { %v2639_v20 = vsel %vm66_vm1, %v2635_v5, 0.0  ;;  %3411 = vmatprep.subr.bf16.mxu1 %v3574_v0 }
 0xfd2   :  { %2640 = vadd.xlane.f32.xlu1 %v2639_v20 }
 0xfd4   :  { %3412 = vmatpush3.bf16.msra.mxu1 %v3486_v12 }
 0xfd5   :  { %3429 = vmatprep.subr.bf16.mxu1 %v3574_v0 }
0x105d   :  { %v2638_v36 = vpop.xlane.xlu0 %2637 }
0x105e   :  { %v2642_v22 = vmul.f32 0.03125, %v2638_v36 }
0x105f   :  { %v2641_v17 = vpop.xlane.xlu1 %2640 }
0x1060   :  { %v2644_v18 = vsub.f32 %v2634_v60, %v2642_v22  ;;  %v2643_v23 = vmul.f32 0.03125, %v2641_v17 }
0x1062   :  { %v2645_v39 = vsub.f32 %v2635_v5, %v2643_v23  ;;  %v2646_v29 = vmul.f32 %v2644_v18, %v2644_v18 }
0x1064   :  { %v2648_v42 = vsel %vm66_vm1, %v2646_v29, 0.0  ;;  %v2647_v15 = vmul.f32 %v2645_v39, %v2645_v39  ;;  %v3492_v29 = vld [vmem:[%s4303_s7 + $0x8] sm:$0xff]  }
0x1065   :  { %2649 = vadd.xlane.f32.xlu0 %v2648_v42 }
0x1066   :  { %v2651_v9 = vsel %vm66_vm1, %v2647_v15, 0.0 }
0x1069   :  { %2652 = vadd.xlane.f32.xlu0 %v2651_v9 }
0x10f2   :  { %v2650_v8 = vpop.xlane.xlu0 %2649 }
0x10f3   :  { %v2654_v26 = vmul.f32 0.03125, %v2650_v8 }
0x10f5   :  { %v2656_v11 = vadd.f32 1e-05, %v2654_v26 }
0x10f6   :  { %v2653_v30 = vpop.xlane.xlu0 %2652 }
0x10f7   :  { %3565 = vrsqrt.f32 %v2656_v11  ;;  %v2655_v34 = vmul.f32 0.03125, %v2653_v30 }
0x10f9   :  { %v2657_v37 = vadd.f32 1e-05, %v2655_v34 }
0x10fb   :  { %3567 = vrsqrt.f32 %v2657_v37 }
0x1101   :  { %v3566_v38 = vpop.eup %3565 }
0x1102   :  { %v2660_v24 = vmul.f32 %v3566_v38, %v2644_v18 }
0x1104   :  { %v2666_v33 = vmul.f32 %v2665_v43, %v2660_v24 }
0x1105   :  { %v3568_v44 = vpop.eup %3567 }
0x1106   :  { %v2661_v35 = vmul.f32 %v3568_v44, %v2645_v39  ;;  %v2672_v50 = vadd.f32 %v2671_v47, %v2666_v33  ;;  %v3491_v39 = vld [vmem:[%s4303_s7] sm:$0xff]  }
0x1107   :  { %v3024_v44 = vld [vmem:[%s4304_s8] ss:$0 sm:$0xff] }
0x1108   :  { %v2667_v48 = vmul.f32 %v2665_v43, %v2661_v35 }
0x110a   :  { %v2673_v51 = vadd.f32 %v2671_v47, %v2667_v48 }
0x110c   :  { %v2674_v52 = vpack.c.bf16 %v2673_v51, %v2672_v50 }
0x110e   :  { %3414 = vmatmul.mubr.msk.bf16.vlgmr.msra.gmra.mrb[88].mxu1 %vm66_vm1, %v2674_v52 }
0x110f   :  { %3433 = vmatprep.mubr.msk.bf16.mxu1 %vm3575_vm0, %v3574_v0  ;;  %3430 = vmatpush3.bf16.msra.mxu1 %v3491_v39 }
0x1110   :  { %3431 = vmatprep.subr.bf16.mxu1 %v3574_v0  ;;  %v2861_v0 = vrot.slane %v3986_v19, %v1450_v3 }
0x1113   :  { %3432 = vmatpush3.bf16.msra.mxu1 %v3492_v29 }
0x11e1   :  { %v2733_v6 = vpop.f32.mrb[88].mxu1 }
0x11e2   :  { %v2734_v7 = vadd.f32 %v2733_v6, %v2683_v53  ;;  %v3415_v54 = vpop.f32.mrb[89].mxu1 }
0x11e3   :  { %v2736_v31 = vpop.f32.mrb[90].mxu1 }
0x11e4   :  { %v2737_v40 = vadd.f32 %v2736_v31, %v2683_v53  ;;  %v3416_v55 = vpop.f32.mrb[91].mxu1  ;;  %v2740_v45 = vmax.f32 %v2734_v7, 0.0 }
0x11e6   :  { %v2741_v46 = vmax.f32 %v2737_v40, 0.0 }
0x11e8   :  { %v2742_v58 = vpack.c.bf16 %v2741_v46, %v2740_v45 }
0x11ea   :  { %3426 = vmatmul.mubr.msk.bf16.vlgmr.msra.gmra.mrb[88].mxu0 %vm1369_vm5, %v2742_v58 }
0x12bd   :  { %v2817_v57 = vpop.f32.mrb[88].mxu0 }
0x12be   :  { %v2818_v59 = vadd.f32 %v2817_v57, %v2755_v56  ;;  %v3427_v63 = vpop.f32.mrb[89].mxu0 }
0x12bf   :  { %v2820_v1 = vpop.f32.mrb[90].mxu0 }
0x12c0   :  { %v2821_v21 = vadd.f32 %v2820_v1, %v2755_v56  ;;  %v3428_v4 = vpop.f32.mrb[91].mxu0  ;;  %v2824_v27 = vadd.f32 %v2818_v59, %v2672_v50 }
0x12c2   :  { %v2826_v28 = vsel %vm66_vm1, %v2824_v27, 0.0  ;;  %v2825_v13 = vadd.f32 %v2821_v21, %v2673_v51 }
0x12c3   :  { %2827 = vadd.xlane.f32.xlu1 %v2826_v28 }
0x12c4   :  { %v2829_v16 = vsel %vm66_vm1, %v2825_v13, 0.0 }
0x12c5   :  { %2830 = vadd.xlane.f32.xlu0 %v2829_v16 }
0x1350   :  { %v2828_v60 = vpop.xlane.xlu1 %2827 }
0x1351   :  { %v2832_v62 = vmul.f32 0.03125, %v2828_v60 }
0x1352   :  { %v2831_v5 = vpop.xlane.xlu0 %2830 }
0x1353   :  { %v2834_v20 = vsub.f32 %v2824_v27, %v2832_v62  ;;  %v2833_v36 = vmul.f32 0.03125, %v2831_v5 }
0x1355   :  { %v2835_v32 = vsub.f32 %v2825_v13, %v2833_v36  ;;  %v2836_v22 = vmul.f32 %v2834_v20, %v2834_v20 }
0x1357   :  { %v2838_v17 = vsel %vm66_vm1, %v2836_v22, 0.0  ;;  %v2837_v18 = vmul.f32 %v2835_v32, %v2835_v32 }
0x1358   :  { %2839 = vadd.xlane.f32.xlu1 %v2838_v17 }
0x1359   :  { %v2841_v23 = vsel %vm66_vm1, %v2837_v18, 0.0 }
0x135a   :  { %2842 = vadd.xlane.f32.xlu0 %v2841_v23 }
0x13e5   :  { %v2840_v42 = vpop.xlane.xlu1 %2839 }
0x13e6   :  { %v2844_v15 = vmul.f32 0.03125, %v2840_v42 }
0x13e7   :  { %v2843_v9 = vpop.xlane.xlu0 %2842 }
0x13e8   :  { %v2846_v14 = vadd.f32 1e-05, %v2844_v15  ;;  %v2845_v12 = vmul.f32 0.03125, %v2843_v9 }
0x13ea   :  { %3569 = vrsqrt.f32 %v2846_v14  ;;  %v2847_v49 = vadd.f32 1e-05, %v2845_v12 }
0x13ec   :  { %3571 = vrsqrt.f32 %v2847_v49 }
0x13f4   :  { %v3570_v8 = vpop.eup %3569 }
0x13f5   :  { %v2850_v26 = vmul.f32 %v3570_v8, %v2834_v20 }
0x13f6   :  { %v3572_v11 = vpop.eup %3571 }
0x13f7   :  { %v2856_v30 = vmul.f32 %v2855_v25, %v2850_v26  ;;  %v2851_v34 = vmul.f32 %v3572_v11, %v2835_v32 }
0x13f9   :  { %v2857_v37 = vmul.f32 %v2855_v25, %v2851_v34  ;;  %v2862_v38 = vadd.f32 %v2861_v0, %v2856_v30 }
0x13fb   :  { %v2863_v43 = vadd.f32 %v2861_v0, %v2857_v37 }
0x13fd   :  { %v2864_v24 = vpack.c.bf16 %v2863_v43, %v2862_v38 }
0x13ff   :  { %3434 = vmatmul.mubr.msk.bf16.vlgmr.msra.gmra.mrb[92].mxu1 %vm66_vm1, %v2864_v24 }
0x14d2   :  { %v2925_v61 = vpop.f32.mrb[92].mxu1 }
0x14d3   :  { %v2926_v33 = vadd.f32 %v3024_v44, %v2925_v61  ;;  %v3435_v35 = vpop.f32.mrb[93].mxu1 }
0x14d4   :  { %v2928_v47 = vpop.f32.mrb[94].mxu1 }
0x14d5   :  { %2932 = vst [vmem:[%s4305_s9] sm:$0xff] %v2926_v33  ;;  %v2929_v10 = vadd.f32 %v3024_v44, %v2928_v47  ;;  %v3436_v3 = vpop.f32.mrb[95].mxu1 }
0x14d7   :  { %2933 = vst [vmem:[%s4305_s9 + $0x8] sm:$0xff] %v2929_v10 }

</bundles_post_ra>
